<compile_context>
chip_gen: v7x
topology: tpu7x:2x2x1
jax: 0.10.0
libtpu: 0.0.40
codegen_flags: <defaults>
</compile_context>

<pallas_src>
import functools

import jax
import jax.numpy as jnp
import numpy as np
from jax.experimental import pallas as pl
from jax.experimental.pallas import tpu as pltpu

MODEL_DIM = 32
NUM_HEADS = 4
HEAD_DIM = MODEL_DIM // NUM_HEADS
FF_DIM = 64
EPS = 1e-5  # nn.LayerNorm default


def _layer_norm(x, gamma, beta):
    mu = jnp.mean(x, axis=-1, keepdims=True)
    var = jnp.mean((x - mu) ** 2, axis=-1, keepdims=True)
    return (x - mu) * jax.lax.rsqrt(var + EPS) * gamma + beta


# rows of the packed small-vector slab
_BO, _B1, _B2, _G1, _BE1, _G2, _BE2 = range(7)


def self_attn_kernel(x_ref, wqkv_ref, bqkv_ref, wo_ref, w1_ref, w2_ref, vec_ref,
                     o_ref, *, n):
    rows, d = x_ref.shape              # rows = tile * n (static), d = MODEL_DIM
    tile = rows // n
    hd, nh = HEAD_DIM, NUM_HEADS

    x = x_ref[...]                      # (rows, d) f32 — kept f32 for residuals
    x_bf = x.astype(jnp.bfloat16)

    vec = vec_ref[...]                  # (7, FF_DIM) f32
    bo, b1, b2 = vec[_BO, :d], vec[_B1, :], vec[_B2, :d]
    g1, be1 = vec[_G1, :d], vec[_BE1, :d]
    g2, be2 = vec[_G2, :d], vec[_BE2, :d]

    # ---- fused, lane-padded Q/K/V projection: (rows, D) x (D, 128) bf16 MXU ----
    qkv = jnp.dot(x_bf, wqkv_ref[...], preferred_element_type=jnp.float32)
    qkv = qkv + bqkv_ref[...]           # (rows, 128); cols 3D..127 stay zero
    # softmax scale is already folded into the Q weights/bias.

    # ---- heads -> leading batch dim (== torch cat(split(., -1), dim=0)) ----
    q = jnp.concatenate([qkv[:, h * hd:(h + 1) * hd] for h in range(nh)], axis=0)
    k = jnp.concatenate([qkv[:, d + h * hd:d + (h + 1) * hd] for h in range(nh)], axis=0)
    v = jnp.concatenate([qkv[:, 2 * d + h * hd:2 * d + (h + 1) * hd] for h in range(nh)], axis=0)
    q = q.reshape(nh * tile, n, hd)     # leading-dim split: free
    k = k.reshape(nh * tile, n, hd)
    v = v.reshape(nh * tile, n, hd)

    # ---- one batched score matmul + one softmax + one batched PV matmul ----
    s = jnp.einsum('bnd,bmd->bnm', q, k,
                   preferred_element_type=jnp.float32)          # (nh*tile, n, n)
    s = s - jnp.max(s, axis=-1, keepdims=True)
    p = jnp.exp(s)
    p = p / jnp.sum(p, axis=-1, keepdims=True)                  # exact divide
    ctx = jnp.einsum('bnm,bmd->bnd',
                     p.astype(jnp.bfloat16), v.astype(jnp.bfloat16),
                     preferred_element_type=jnp.float32)        # (nh*tile, n, hd)

    # ---- heads back to channels (== torch cat(split(., batch), dim=-1)) ----
    ctx = ctx.reshape(nh * rows, hd)
    attn = jnp.concatenate([ctx[h * rows:(h + 1) * rows, :] for h in range(nh)],
                           axis=-1)                             # (rows, d)
    attn = jnp.dot(attn.astype(jnp.bfloat16), wo_ref[...],
                   preferred_element_type=jnp.float32) + bo

    # dropout (p=0, eval semantics) -> identity
    # ---- residual + LayerNorm 1 (f32 statistics) ----
    h1 = _layer_norm(x + attn, g1, be1)

    # ---- feed-forward: Linear -> ReLU -> Linear (bf16 MXU, f32 acc) ----
    ff = jnp.dot(h1.astype(jnp.bfloat16), w1_ref[...],
                 preferred_element_type=jnp.float32) + b1
    ff = jnp.maximum(ff, 0.0)
    ff = jnp.dot(ff.astype(jnp.bfloat16), w2_ref[...],
                 preferred_element_type=jnp.float32) + b2

    # ---- residual + LayerNorm 2 ----
    o_ref[...] = _layer_norm(h1 + ff, g2, be2)


def _pack_params(params):
    D, F = MODEL_DIM, FF_DIM
    qkv_cols = ((3 * D + 127) // 128) * 128       # lane-pad fused QKV to 128
    scale = 1.0 / (HEAD_DIM ** 0.5)

    w_qkv = jnp.concatenate([params["wq"] * scale, params["wk"], params["wv"]],
                            axis=1)                                   # (D, 3D)
    w_qkv = jnp.pad(w_qkv, ((0, 0), (0, qkv_cols - 3 * D)))           # (D, 128)
    b_qkv = jnp.concatenate([params["bq"].reshape(1, D) * scale,
                             params["bk"].reshape(1, D),
                             params["bv"].reshape(1, D)], axis=1)
    b_qkv = jnp.pad(b_qkv, ((0, 0), (0, qkv_cols - 3 * D)))           # (1, 128) f32

    def row(v):
        v = jnp.asarray(v, jnp.float32).reshape(-1)
        return jnp.pad(v, (0, F - v.shape[0]))

    vecs = jnp.stack([row(params[k]) for k in
                      ("bo", "b1", "b2", "g1", "be1", "g2", "be2")], axis=0)  # (7, F)

    bf = jnp.bfloat16
    return (w_qkv.astype(bf), b_qkv.astype(jnp.float32),
            params["wo"].astype(bf), params["w1"].astype(bf),
            params["w2"].astype(bf), vecs.astype(jnp.float32))


def self_attention_layer(x, params, tile=512, min_steps=2):
    """x: (B, T, N, D) float32. Attention over N (module default dim=-2)."""
    B, T, N, D = x.shape
    assert D == MODEL_DIM
    BT = B * T

    # tile = number of (b, t) slabs per grid step.  Cap so the grid has at
    # least `min_steps` steps when there is enough work (v7x: 2 TensorCores),
    # and round to a multiple of 8 rows (sublane constraint on the row block).
    t = min(tile, BT)
    if BT >= 8 * min_steps:
        t = min(t, pl.cdiv(BT, min_steps))
    t = ((max(t, 1) + 7) // 8) * 8
    num_blocks = pl.cdiv(BT, t)
    BT_pad = num_blocks * t

    xf = x.reshape(BT * N, D).astype(jnp.float32)
    if BT_pad != BT:
        xf = jnp.pad(xf, ((0, (BT_pad - BT) * N), (0, 0)))  # whole padded slabs

    w_qkv, b_qkv, wo, w1, w2, vecs = _pack_params(params)
    qkv_cols = w_qkv.shape[1]
    rows_blk = t * N

    flops = BT_pad * (2 * N * D * qkv_cols                 # fused QKV proj
                      + 4 * NUM_HEADS * N * N * HEAD_DIM   # QK^T + PV
                      + 2 * N * D * D                      # out proj
                      + 4 * N * D * FF_DIM)                # FFN
    transcendentals = BT_pad * (NUM_HEADS * N * N + 2 * N)
    bytes_accessed = (2 * BT_pad * N * D * 4
                      + sum(int(a.size) * a.dtype.itemsize
                            for a in (w_qkv, b_qkv, wo, w1, w2, vecs)))

    out = pl.pallas_call(
        functools.partial(self_attn_kernel, n=N),
        out_shape=jax.ShapeDtypeStruct((BT_pad * N, D), jnp.float32),
        grid=(num_blocks,),
        in_specs=[
            pl.BlockSpec((rows_blk, D), lambda i: (i, 0)),
            pl.BlockSpec(w_qkv.shape, lambda i: (0, 0)),
            pl.BlockSpec(b_qkv.shape, lambda i: (0, 0)),
            pl.BlockSpec(wo.shape, lambda i: (0, 0)),
            pl.BlockSpec(w1.shape, lambda i: (0, 0)),
            pl.BlockSpec(w2.shape, lambda i: (0, 0)),
            pl.BlockSpec(vecs.shape, lambda i: (0, 0)),
        ],
        out_specs=pl.BlockSpec((rows_blk, D), lambda i: (i, 0)),
        compiler_params=pltpu.CompilerParams(
            dimension_semantics=("parallel",),
            vmem_limit_bytes=48 * 1024 * 1024),
        cost_estimate=pl.CostEstimate(
            flops=int(flops), transcendentals=int(transcendentals),
            bytes_accessed=int(bytes_accessed)),
    )(xf, w_qkv, b_qkv, wo, w1, w2, vecs)

    return out[:BT * N].reshape(B, T, N, D)


# ----------------------- deterministic parameter init -----------------------
def init_params(key):
    ks = jax.random.split(key, 16)

    def lin_w(k, din, dout):
        return (jax.random.normal(k, (din, dout), jnp.float32)
                / jnp.sqrt(jnp.float32(din)))

    def lin_b(k, dout):
        return 0.1 * jax.random.normal(k, (1, dout), jnp.float32)

    D, F = MODEL_DIM, FF_DIM
    return {
        "wq": lin_w(ks[0], D, D), "bq": lin_b(ks[1], D),
        "wk": lin_w(ks[2], D, D), "bk": lin_b(ks[3], D),
        "wv": lin_w(ks[4], D, D), "bv": lin_b(ks[5], D),
        "wo": lin_w(ks[6], D, D), "bo": lin_b(ks[7], D),
        "w1": lin_w(ks[8], D, F), "b1": lin_b(ks[9], F),
        "w2": lin_w(ks[10], F, D), "b2": lin_b(ks[11], D),
        "g1": 1.0 + 0.1 * jax.random.normal(ks[12], (1, D), jnp.float32),
        "be1": 0.1 * jax.random.normal(ks[13], (1, D), jnp.float32),
        "g2": 1.0 + 0.1 * jax.random.normal(ks[14], (1, D), jnp.float32),
        "be2": 0.1 * jax.random.normal(ks[15], (1, D), jnp.float32),
    }


# ----------------------------- pure-JAX reference ----------------------------
def reference(x, p):
    def ln(z, g, b):
        mu = z.mean(-1, keepdims=True)
        var = ((z - mu) ** 2).mean(-1, keepdims=True)
        return (z - mu) / jnp.sqrt(var + EPS) * g + b

    q = x @ p["wq"] + p["bq"]
    k = x @ p["wk"] + p["bk"]
    v = x @ p["wv"] + p["bv"]
    outs = []
    for h in range(NUM_HEADS):
        sl = slice(h * HEAD_DIM, (h + 1) * HEAD_DIM)
        s = jnp.einsum("btnd,btmd->btnm", q[..., sl], k[..., sl]) / HEAD_DIM ** 0.5
        pm = jax.nn.softmax(s, axis=-1)
        outs.append(jnp.einsum("btnm,btmd->btnd", pm, v[..., sl]))
    attn = jnp.concatenate(outs, -1) @ p["wo"] + p["bo"]
    h1 = ln(x + attn, p["g1"], p["be1"])
    ff = jnp.maximum(h1 @ p["w1"] + p["b1"], 0.0) @ p["w2"] + p["b2"]
    return ln(h1 + ff, p["g2"], p["be2"])


if __name__ == "__main__":
    key = jax.random.PRNGKey(0)
    kx, kp = jax.random.split(key)

    B, T, N, D = 2, 3, 8, MODEL_DIM  # batch, in_steps, num_nodes, model_dim
    x = jax.random.normal(kx, (B, T, N, D), jnp.float32)
    params = init_params(kp)

    out = jax.block_until_ready(self_attention_layer(x, params))
    ref = jax.block_until_ready(reference(x, params))

    # bf16 matmul operands (f32 accumulation) vs. the all-f32 reference:
    # ~2^-8..2^-9 relative error per matmul in the chain -> bf16 accuracy budget.
    np.testing.assert_allclose(np.asarray(out), np.asarray(ref),
                               rtol=3e-2, atol=3e-2)
    print("KERNEL_OK")
</pallas_src>

<mosaic_0001>
module attributes {stable_mosaic.version = 11 : i64} {
  func.func @self_attn_kernel(%arg0: i32, %arg1: memref<64x32xf32, #tpu.memory_space<vmem>>, %arg2: memref<32x128xbf16, #tpu.memory_space<vmem>>, %arg3: memref<1x128xf32, #tpu.memory_space<vmem>>, %arg4: memref<32x32xbf16, #tpu.memory_space<vmem>>, %arg5: memref<32x64xbf16, #tpu.memory_space<vmem>>, %arg6: memref<64x32xbf16, #tpu.memory_space<vmem>>, %arg7: memref<7x64xf32, #tpu.memory_space<vmem>>, %arg8: memref<64x32xf32, #tpu.memory_space<vmem>>) attributes {dimension_semantics = [#tpu.dimension_semantics<parallel>], iteration_bounds = array<i64: 1>, scalar_prefetch = 0 : i64, scratch_operands = 0 : i64, tpu.core_type = #tpu.core_type<tc>, window_params = [{transform_indices = @transform_0, window_bounds = array<i64: 64, 32>}, {pipeline_mode = #tpu.pipeline_mode<synchronous>, transform_indices = @transform_1, window_bounds = array<i64: 32, 128>}, {pipeline_mode = #tpu.pipeline_mode<synchronous>, transform_indices = @transform_2, window_bounds = array<i64: 1, 128>}, {pipeline_mode = #tpu.pipeline_mode<synchronous>, transform_indices = @transform_3, window_bounds = array<i64: 32, 32>}, {pipeline_mode = #tpu.pipeline_mode<synchronous>, transform_indices = @transform_4, window_bounds = array<i64: 32, 64>}, {pipeline_mode = #tpu.pipeline_mode<synchronous>, transform_indices = @transform_5, window_bounds = array<i64: 64, 32>}, {pipeline_mode = #tpu.pipeline_mode<synchronous>, transform_indices = @transform_6, window_bounds = array<i64: 7, 64>}, {transform_indices = @transform_7, window_bounds = array<i64: 64, 32>}]} {
    %c0 = arith.constant 0 : index
    %c0_0 = arith.constant 0 : index
    %0 = vector.load %arg1[%c0, %c0_0] : memref<64x32xf32, #tpu.memory_space<vmem>>, vector<64x32xf32>
    %1 = arith.truncf %0 : vector<64x32xf32> to vector<64x32xbf16>
    %c0_1 = arith.constant 0 : index
    %c0_2 = arith.constant 0 : index
    %2 = vector.load %arg7[%c0_1, %c0_2] : memref<7x64xf32, #tpu.memory_space<vmem>>, vector<7x64xf32>
    %3 = vector.extract_strided_slice %2 {offsets = [0, 0], sizes = [1, 32], strides = [1, 1]} : vector<7x64xf32> to vector<1x32xf32>
    %4 = vector.shape_cast %3 : vector<1x32xf32> to vector<32xf32>
    %5 = vector.extract_strided_slice %2 {offsets = [1, 0], sizes = [1, 64], strides = [1, 1]} : vector<7x64xf32> to vector<1x64xf32>
    %6 = vector.shape_cast %5 : vector<1x64xf32> to vector<64xf32>
    %7 = vector.extract_strided_slice %2 {offsets = [2, 0], sizes = [1, 32], strides = [1, 1]} : vector<7x64xf32> to vector<1x32xf32>
    %8 = vector.shape_cast %7 : vector<1x32xf32> to vector<32xf32>
    %9 = vector.extract_strided_slice %2 {offsets = [3, 0], sizes = [1, 32], strides = [1, 1]} : vector<7x64xf32> to vector<1x32xf32>
    %10 = vector.shape_cast %9 : vector<1x32xf32> to vector<32xf32>
    %11 = vector.extract_strided_slice %2 {offsets = [4, 0], sizes = [1, 32], strides = [1, 1]} : vector<7x64xf32> to vector<1x32xf32>
    %12 = vector.shape_cast %11 : vector<1x32xf32> to vector<32xf32>
    %13 = vector.extract_strided_slice %2 {offsets = [5, 0], sizes = [1, 32], strides = [1, 1]} : vector<7x64xf32> to vector<1x32xf32>
    %14 = vector.shape_cast %13 : vector<1x32xf32> to vector<32xf32>
    %15 = vector.extract_strided_slice %2 {offsets = [6, 0], sizes = [1, 32], strides = [1, 1]} : vector<7x64xf32> to vector<1x32xf32>
    %16 = vector.shape_cast %15 : vector<1x32xf32> to vector<32xf32>
    %c0_3 = arith.constant 0 : index
    %c0_4 = arith.constant 0 : index
    %17 = vector.load %arg2[%c0_3, %c0_4] : memref<32x128xbf16, #tpu.memory_space<vmem>>, vector<32x128xbf16>
    %cst = arith.constant dense<0.000000e+00> : vector<64x128xf32>
    %18 = tpu.matmul %1, %17, %cst {dimension_numbers = #tpu.dot_dimension_numbers<[1], [0], [0], [1], [0, 0, 1, 1], [], []>} : vector<64x32xbf16>, vector<32x128xbf16>, vector<64x128xf32> -> vector<64x128xf32>
    %c0_5 = arith.constant 0 : index
    %c0_6 = arith.constant 0 : index
    %19 = vector.load %arg3[%c0_5, %c0_6] : memref<1x128xf32, #tpu.memory_space<vmem>>, vector<1x128xf32>
    %20 = vector.broadcast %19 : vector<1x128xf32> to vector<64x128xf32>
    %21 = arith.addf %18, %20 : vector<64x128xf32>
    %22 = vector.extract_strided_slice %21 {offsets = [0, 0], sizes = [64, 8], strides = [1, 1]} : vector<64x128xf32> to vector<64x8xf32>
    %23 = vector.extract_strided_slice %21 {offsets = [0, 8], sizes = [64, 8], strides = [1, 1]} : vector<64x128xf32> to vector<64x8xf32>
    %24 = vector.extract_strided_slice %21 {offsets = [0, 16], sizes = [64, 8], strides = [1, 1]} : vector<64x128xf32> to vector<64x8xf32>
    %25 = vector.extract_strided_slice %21 {offsets = [0, 24], sizes = [64, 8], strides = [1, 1]} : vector<64x128xf32> to vector<64x8xf32>
    %26 = tpu.concatenate %22, %23, %24, %25 in 0 : vector<64x8xf32>, vector<64x8xf32>, vector<64x8xf32>, vector<64x8xf32> -> vector<256x8xf32>
    %27 = vector.extract_strided_slice %21 {offsets = [0, 32], sizes = [64, 8], strides = [1, 1]} : vector<64x128xf32> to vector<64x8xf32>
    %28 = vector.extract_strided_slice %21 {offsets = [0, 40], sizes = [64, 8], strides = [1, 1]} : vector<64x128xf32> to vector<64x8xf32>
    %29 = vector.extract_strided_slice %21 {offsets = [0, 48], sizes = [64, 8], strides = [1, 1]} : vector<64x128xf32> to vector<64x8xf32>
    %30 = vector.extract_strided_slice %21 {offsets = [0, 56], sizes = [64, 8], strides = [1, 1]} : vector<64x128xf32> to vector<64x8xf32>
    %31 = tpu.concatenate %27, %28, %29, %30 in 0 : vector<64x8xf32>, vector<64x8xf32>, vector<64x8xf32>, vector<64x8xf32> -> vector<256x8xf32>
    %32 = vector.extract_strided_slice %21 {offsets = [0, 64], sizes = [64, 8], strides = [1, 1]} : vector<64x128xf32> to vector<64x8xf32>
    %33 = vector.extract_strided_slice %21 {offsets = [0, 72], sizes = [64, 8], strides = [1, 1]} : vector<64x128xf32> to vector<64x8xf32>
    %34 = vector.extract_strided_slice %21 {offsets = [0, 80], sizes = [64, 8], strides = [1, 1]} : vector<64x128xf32> to vector<64x8xf32>
    %35 = vector.extract_strided_slice %21 {offsets = [0, 88], sizes = [64, 8], strides = [1, 1]} : vector<64x128xf32> to vector<64x8xf32>
    %36 = tpu.concatenate %32, %33, %34, %35 in 0 : vector<64x8xf32>, vector<64x8xf32>, vector<64x8xf32>, vector<64x8xf32> -> vector<256x8xf32>
    %37 = vector.shape_cast %26 : vector<256x8xf32> to vector<32x8x8xf32>
    %38 = vector.shape_cast %31 : vector<256x8xf32> to vector<32x8x8xf32>
    %39 = vector.shape_cast %36 : vector<256x8xf32> to vector<32x8x8xf32>
    "tpu.trace_start"() <{level = 10 : i32, message = "bnd,bmd->bnm"}> : () -> ()
    %cst_7 = arith.constant dense<0.000000e+00> : vector<32x8x8xf32>
    %40 = tpu.matmul %37, %38, %cst_7 {dimension_numbers = #tpu.dot_dimension_numbers<[2], [2], [1], [1], [0, 0, 0, 1, 1, 1], [0], [0]>} : vector<32x8x8xf32>, vector<32x8x8xf32>, vector<32x8x8xf32> -> vector<32x8x8xf32>
    "tpu.trace_stop"() : () -> ()
    %cst_8 = arith.constant dense<0xFF800000> : vector<32x8xf32>
    %41 = vector.multi_reduction <maximumf>, %40, %cst_8 [2] : vector<32x8x8xf32> to vector<32x8xf32>
    %42 = vector.shape_cast %41 : vector<32x8xf32> to vector<32x8x1xf32>
    %43 = vector.broadcast %42 : vector<32x8x1xf32> to vector<32x8x8xf32>
    %44 = arith.subf %40, %43 : vector<32x8x8xf32>
    %45 = math.exp %44 : vector<32x8x8xf32>
    %cst_9 = arith.constant dense<0.000000e+00> : vector<32x8xf32>
    %46 = vector.multi_reduction <add>, %45, %cst_9 [2] : vector<32x8x8xf32> to vector<32x8xf32>
    %47 = vector.shape_cast %46 : vector<32x8xf32> to vector<32x8x1xf32>
    %48 = vector.broadcast %47 : vector<32x8x1xf32> to vector<32x8x8xf32>
    %49 = arith.divf %45, %48 : vector<32x8x8xf32>
    %50 = arith.truncf %49 : vector<32x8x8xf32> to vector<32x8x8xbf16>
    %51 = arith.truncf %39 : vector<32x8x8xf32> to vector<32x8x8xbf16>
    "tpu.trace_start"() <{level = 10 : i32, message = "bnm,bmd->bnd"}> : () -> ()
    %cst_10 = arith.constant dense<0.000000e+00> : vector<32x8x8xf32>
    %52 = tpu.matmul %50, %51, %cst_10 {dimension_numbers = #tpu.dot_dimension_numbers<[2], [1], [1], [2], [0, 0, 0, 1, 1, 2], [0], [0]>} : vector<32x8x8xbf16>, vector<32x8x8xbf16>, vector<32x8x8xf32> -> vector<32x8x8xf32>
    "tpu.trace_stop"() : () -> ()
    %53 = vector.shape_cast %52 : vector<32x8x8xf32> to vector<256x8xf32>
    %54 = vector.extract_strided_slice %53 {offsets = [0, 0], sizes = [64, 8], strides = [1, 1]} : vector<256x8xf32> to vector<64x8xf32>
    %55 = vector.extract_strided_slice %53 {offsets = [64, 0], sizes = [64, 8], strides = [1, 1]} : vector<256x8xf32> to vector<64x8xf32>
    %56 = vector.extract_strided_slice %53 {offsets = [128, 0], sizes = [64, 8], strides = [1, 1]} : vector<256x8xf32> to vector<64x8xf32>
    %57 = vector.extract_strided_slice %53 {offsets = [192, 0], sizes = [64, 8], strides = [1, 1]} : vector<256x8xf32> to vector<64x8xf32>
    %58 = tpu.concatenate %54, %55, %56, %57 in 1 : vector<64x8xf32>, vector<64x8xf32>, vector<64x8xf32>, vector<64x8xf32> -> vector<64x32xf32>
    %59 = arith.truncf %58 : vector<64x32xf32> to vector<64x32xbf16>
    %c0_11 = arith.constant 0 : index
    %c0_12 = arith.constant 0 : index
    %60 = vector.load %arg4[%c0_11, %c0_12] : memref<32x32xbf16, #tpu.memory_space<vmem>>, vector<32x32xbf16>
    %cst_13 = arith.constant dense<0.000000e+00> : vector<64x32xf32>
    %61 = tpu.matmul %59, %60, %cst_13 {dimension_numbers = #tpu.dot_dimension_numbers<[1], [0], [0], [1], [0, 0, 1, 1], [], []>} : vector<64x32xbf16>, vector<32x32xbf16>, vector<64x32xf32> -> vector<64x32xf32>
    %62 = vector.shape_cast %4 : vector<32xf32> to vector<1x32xf32>
    %63 = vector.broadcast %62 : vector<1x32xf32> to vector<64x32xf32>
    %64 = arith.addf %61, %63 : vector<64x32xf32>
    %65 = arith.addf %0, %64 : vector<64x32xf32>
    %cst_14 = arith.constant dense<0.000000e+00> : vector<64xf32>
    %66 = vector.multi_reduction <add>, %65, %cst_14 [1] : vector<64x32xf32> to vector<64xf32>
    %67 = vector.shape_cast %66 : vector<64xf32> to vector<64x1xf32>
    %cst_15 = arith.constant 3.200000e+01 : f32
    %68 = vector.broadcast %cst_15 : f32 to vector<64x1xf32>
    %69 = arith.divf %67, %68 : vector<64x1xf32>
    %70 = vector.broadcast %69 : vector<64x1xf32> to vector<64x32xf32>
    %71 = arith.subf %65, %70 : vector<64x32xf32>
    %72 = arith.mulf %71, %71 : vector<64x32xf32>
    %cst_16 = arith.constant dense<0.000000e+00> : vector<64xf32>
    %73 = vector.multi_reduction <add>, %72, %cst_16 [1] : vector<64x32xf32> to vector<64xf32>
    %74 = vector.shape_cast %73 : vector<64xf32> to vector<64x1xf32>
    %cst_17 = arith.constant 3.200000e+01 : f32
    %75 = vector.broadcast %cst_17 : f32 to vector<64x1xf32>
    %76 = arith.divf %74, %75 : vector<64x1xf32>
    %77 = vector.broadcast %69 : vector<64x1xf32> to vector<64x32xf32>
    %78 = arith.subf %65, %77 : vector<64x32xf32>
    %cst_18 = arith.constant 9.99999974E-6 : f32
    %79 = vector.broadcast %cst_18 : f32 to vector<64x1xf32>
    %80 = arith.addf %76, %79 : vector<64x1xf32>
    %81 = math.rsqrt %80 : vector<64x1xf32>
    %82 = vector.broadcast %81 : vector<64x1xf32> to vector<64x32xf32>
    %83 = arith.mulf %78, %82 : vector<64x32xf32>
    %84 = vector.shape_cast %10 : vector<32xf32> to vector<1x32xf32>
    %85 = vector.broadcast %84 : vector<1x32xf32> to vector<64x32xf32>
    %86 = arith.mulf %83, %85 : vector<64x32xf32>
    %87 = vector.shape_cast %12 : vector<32xf32> to vector<1x32xf32>
    %88 = vector.broadcast %87 : vector<1x32xf32> to vector<64x32xf32>
    %89 = arith.addf %86, %88 : vector<64x32xf32>
    %90 = arith.truncf %89 : vector<64x32xf32> to vector<64x32xbf16>
    %c0_19 = arith.constant 0 : index
    %c0_20 = arith.constant 0 : index
    %91 = vector.load %arg5[%c0_19, %c0_20] : memref<32x64xbf16, #tpu.memory_space<vmem>>, vector<32x64xbf16>
    %cst_21 = arith.constant dense<0.000000e+00> : vector<64x64xf32>
    %92 = tpu.matmul %90, %91, %cst_21 {dimension_numbers = #tpu.dot_dimension_numbers<[1], [0], [0], [1], [0, 0, 1, 1], [], []>} : vector<64x32xbf16>, vector<32x64xbf16>, vector<64x64xf32> -> vector<64x64xf32>
    %93 = vector.shape_cast %6 : vector<64xf32> to vector<1x64xf32>
    %94 = vector.broadcast %93 : vector<1x64xf32> to vector<64x64xf32>
    %95 = arith.addf %92, %94 : vector<64x64xf32>
    %cst_22 = arith.constant 0.000000e+00 : f32
    %96 = vector.broadcast %cst_22 : f32 to vector<64x64xf32>
    %97 = arith.maximumf %95, %96 : vector<64x64xf32>
    %98 = arith.truncf %97 : vector<64x64xf32> to vector<64x64xbf16>
    %c0_23 = arith.constant 0 : index
    %c0_24 = arith.constant 0 : index
    %99 = vector.load %arg6[%c0_23, %c0_24] : memref<64x32xbf16, #tpu.memory_space<vmem>>, vector<64x32xbf16>
    %cst_25 = arith.constant dense<0.000000e+00> : vector<64x32xf32>
    %100 = tpu.matmul %98, %99, %cst_25 {dimension_numbers = #tpu.dot_dimension_numbers<[1], [0], [0], [1], [0, 0, 1, 1], [], []>} : vector<64x64xbf16>, vector<64x32xbf16>, vector<64x32xf32> -> vector<64x32xf32>
    %101 = vector.shape_cast %8 : vector<32xf32> to vector<1x32xf32>
    %102 = vector.broadcast %101 : vector<1x32xf32> to vector<64x32xf32>
    %103 = arith.addf %100, %102 : vector<64x32xf32>
    %104 = arith.addf %89, %103 : vector<64x32xf32>
    %cst_26 = arith.constant dense<0.000000e+00> : vector<64xf32>
    %105 = vector.multi_reduction <add>, %104, %cst_26 [1] : vector<64x32xf32> to vector<64xf32>
    %106 = vector.shape_cast %105 : vector<64xf32> to vector<64x1xf32>
    %cst_27 = arith.constant 3.200000e+01 : f32
    %107 = vector.broadcast %cst_27 : f32 to vector<64x1xf32>
    %108 = arith.divf %106, %107 : vector<64x1xf32>
    %109 = vector.broadcast %108 : vector<64x1xf32> to vector<64x32xf32>
    %110 = arith.subf %104, %109 : vector<64x32xf32>
    %111 = arith.mulf %110, %110 : vector<64x32xf32>
    %cst_28 = arith.constant dense<0.000000e+00> : vector<64xf32>
    %112 = vector.multi_reduction <add>, %111, %cst_28 [1] : vector<64x32xf32> to vector<64xf32>
    %113 = vector.shape_cast %112 : vector<64xf32> to vector<64x1xf32>
    %cst_29 = arith.constant 3.200000e+01 : f32
    %114 = vector.broadcast %cst_29 : f32 to vector<64x1xf32>
    %115 = arith.divf %113, %114 : vector<64x1xf32>
    %116 = vector.broadcast %108 : vector<64x1xf32> to vector<64x32xf32>
    %117 = arith.subf %104, %116 : vector<64x32xf32>
    %cst_30 = arith.constant 9.99999974E-6 : f32
    %118 = vector.broadcast %cst_30 : f32 to vector<64x1xf32>
    %119 = arith.addf %115, %118 : vector<64x1xf32>
    %120 = math.rsqrt %119 : vector<64x1xf32>
    %121 = vector.broadcast %120 : vector<64x1xf32> to vector<64x32xf32>
    %122 = arith.mulf %117, %121 : vector<64x32xf32>
    %123 = vector.shape_cast %14 : vector<32xf32> to vector<1x32xf32>
    %124 = vector.broadcast %123 : vector<1x32xf32> to vector<64x32xf32>
    %125 = arith.mulf %122, %124 : vector<64x32xf32>
    %126 = vector.shape_cast %16 : vector<32xf32> to vector<1x32xf32>
    %127 = vector.broadcast %126 : vector<1x32xf32> to vector<64x32xf32>
    %128 = arith.addf %125, %127 : vector<64x32xf32>
    %c0_31 = arith.constant 0 : index
    %c0_32 = arith.constant 0 : index
    %129 = vector.load %arg8[%c0_31, %c0_32] : memref<64x32xf32, #tpu.memory_space<vmem>>, vector<64x32xf32>
    tpu.vector_store %arg8[%c0_31, %c0_32], %128 {strides = array<i32>} : memref<64x32xf32, #tpu.memory_space<vmem>>, vector<64x32xf32>,
    return
  }
  func.func @transform_0(%arg0: i32) -> (i32, i32) {
    %c0_i32 = arith.constant 0 : i32
    %c0_i32_0 = arith.constant 0 : i32
    return %arg0, %c0_i32 : i32, i32
  }
  func.func @transform_1(%arg0: i32) -> (i32, i32) {
    %c0_i32 = arith.constant 0 : i32
    %c0_i32_0 = arith.constant 0 : i32
    %c0_i32_1 = arith.constant 0 : i32
    return %c0_i32, %c0_i32_0 : i32, i32
  }
  func.func @transform_2(%arg0: i32) -> (i32, i32) {
    %c0_i32 = arith.constant 0 : i32
    %c0_i32_0 = arith.constant 0 : i32
    %c0_i32_1 = arith.constant 0 : i32
    return %c0_i32, %c0_i32_0 : i32, i32
  }
  func.func @transform_3(%arg0: i32) -> (i32, i32) {
    %c0_i32 = arith.constant 0 : i32
    %c0_i32_0 = arith.constant 0 : i32
    %c0_i32_1 = arith.constant 0 : i32
    return %c0_i32, %c0_i32_0 : i32, i32
  }
  func.func @transform_4(%arg0: i32) -> (i32, i32) {
    %c0_i32 = arith.constant 0 : i32
    %c0_i32_0 = arith.constant 0 : i32
    %c0_i32_1 = arith.constant 0 : i32
    return %c0_i32, %c0_i32_0 : i32, i32
  }
  func.func @transform_5(%arg0: i32) -> (i32, i32) {
    %c0_i32 = arith.constant 0 : i32
    %c0_i32_0 = arith.constant 0 : i32
    %c0_i32_1 = arith.constant 0 : i32
    return %c0_i32, %c0_i32_0 : i32, i32
  }
  func.func @transform_6(%arg0: i32) -> (i32, i32) {
    %c0_i32 = arith.constant 0 : i32
    %c0_i32_0 = arith.constant 0 : i32
    %c0_i32_1 = arith.constant 0 : i32
    return %c0_i32, %c0_i32_0 : i32, i32
  }
  func.func @transform_7(%arg0: i32) -> (i32, i32) {
    %c0_i32 = arith.constant 0 : i32
    %c0_i32_0 = arith.constant 0 : i32
    return %arg0, %c0_i32 : i32, i32
  }
}

</mosaic_0001>

<bundles_post_ra>
// kernel: tpu_custom_call.1
= control target key start
LH: loop header
LB: loop body
LE: loop exit
PB: predicated region body
PF: predicated region fallthrough
CT: control target
= control target key end

     0   :  { %vm63_vm0 = vcmask 261120   ;;  %s6303_s22 = smov 120   ;;  %v7712_v22 = vmov 0.0   ;;  %vm6305_vm1 = vmmov 0   ;;  %s6307_s23 = smov 112   ;;  %vm223_vm2 = vcmask 64512   ;;  %s7704_s1 = inlined_call_operand.vmem [shape: bf16[32,128], index: 1, kind: input, shape index: {}]   ;;  %s7705_s0 = inlined_call_operand.vmem [shape: f32[64,32], index: 0, kind: input, shape index: {}]   ;;  %s7706_s2 = inlined_call_operand.vmem [shape: f32[1,128], index: 2, kind: input, shape index: {}]   ;;  %s7707_s3 = inlined_call_operand.vmem [shape: bf16[32,32], index: 3, kind: input, shape index: {}]   ;;  %s7708_s6 = inlined_call_operand.vmem [shape: f32[7,64], index: 6, kind: input, shape index: {}]   ;;  %s7709_s4 = inlined_call_operand.vmem [shape: bf16[32,64], index: 4, kind: input, shape index: {}]   ;;  %s7710_s5 = inlined_call_operand.vmem [shape: bf16[64,32], index: 5, kind: input, shape index: {}]   ;;  %s7711_s7 = inlined_call_operand.vmem [shape: f32[64,32], index: 7, kind: output, shape index: {}]  }
   0x1   :  { %v6125_v0 = vld [vmem:[%s7704_s1] sm:$0xff]   ;;  %v6126_v1 = vld [vmem:[%s7704_s1 + $0x8] sm:$0xff]   ;;  %v29_v5 = vld [vmem:[%s7705_s0 + $0x10] sm:$0xff]  ;;  %5668 = vmatprep.subr.mxu1 %v7712_v22  ;;  %5670 = vmatprep.mubr.msk.f32.mxu1 %vm6305_vm1, %v7712_v22  ;;  %s6308_s24 = smov 104   ;;  %s6309_s25 = smov 64   ;;  %vm3076_vm3 = vcmask 1043456  }
   0x2   :  { %5651 = vmatprep.subr.bf16.mxu0 %v6125_v0  ;;  %v27_v2 = vld [vmem:[%s7705_s0] sm:$0xff]  ;;  %v28_v3 = vld [vmem:[%s7705_s0 + $0x8] sm:$0xff]  ;;  %v30_v6 = vld [vmem:[%s7705_s0 + $0x18] sm:$0xff]  ;;  %s6310_s26 = smov 8   ;;  %s6311_s27 = smov 16   ;;  %vm4743_vm4 = vcmask 130048  }
   0x3   :  { %5652 = vmatpush3.bf16.msra.mxu0 %v6125_v0  ;;  %v35_v4 = vpack.c.bf16 %v28_v3, %v27_v2  ;;  %v31_v7 = vld [vmem:[%s7705_s0 + $0x20] sm:$0xff]  ;;  %v32_v8 = vld [vmem:[%s7705_s0 + $0x28] sm:$0xff]  ;;  %v36_v9 = vpack.c.bf16 %v30_v6, %v29_v5  ;;  %v33_v11 = vld [vmem:[%s7705_s0 + $0x30] sm:$0xff]  ;;  %s6312_s9 = smov 24   ;;  %vm4752_vm5 = vcmask 195584   ;;  %vm5148_vm6 = vcmask 523264  }
   0x4   :  { %5653 = vmatprep.subr.bf16.mxu0 %v6126_v1  ;;  %v37_v10 = vpack.c.bf16 %v32_v8, %v31_v7  ;;  %v34_v12 = vld [vmem:[%s7705_s0 + $0x38] sm:$0xff]  ;;  %v5374_v14 = vld [vmem:[%s7706_s2] ss:$0 sm:$0xff]  ;;  %s6306_s2 = smov 96  }
   0x5   :  { %5655 = vmatprep.mubr.msk.bf16.mxu0 %vm63_vm0, %v35_v4  ;;  %v38_v13 = vpack.c.bf16 %v34_v12, %v33_v11 }
   0x7   :  { %5654 = vmatpush3.bf16.msra.mxu0 %v6126_v1 }
   0x8   :  { %5663 = vmatprep.subr.mxu0 %v7712_v22 }
   0xa   :  { %5656 = vmatmul.mubr.msk.bf16.vlgmr.msra.gmra.mrb[0].mxu0 %vm63_vm0, %v36_v9 }
   0xb   :  { %5659 = vmatprep.mubr.msk.bf16.mxu0 %vm63_vm0, %v37_v10 }
  0x12   :  { %5660 = vmatmul.mubr.msk.bf16.gmra.mrb[4].mxu0 %vm63_vm0, %v38_v13 }
  0x13   :  { %5665 = vmatprep.mubr.msk.f32.mxu0 %vm6305_vm1, %v7712_v22 }
  0xdd   :  { %v5657_v15 = vpop.f32.mrb[0].mxu0 }
  0xde   :  { %v6390_v16 = vadd.f32 %v5657_v15, %v5374_v14  ;;  %v110_v17 = vpop.f32.mrb[1].mxu0 }
  0xdf   :  { %v6392_v18 = vadd.f32 %v5374_v14, %v110_v17  ;;  %v5658_v19 = vpop.f32.mrb[2].mxu0 }
  0xe0   :  { %153 = vrot.lane.b32.xlu1 %v6390_v16, %s6303_s22  ;;  %v113_v20 = vpop.f32.mrb[3].mxu0  ;;  %v6396_v21 = vadd.f32 %v5658_v19, %v5374_v14 }
  0xe1   :  { %149 = vrot.lane.b32.xlu0 %v6392_v18, %s6303_s22  ;;  %v6400_v23 = vadd.f32 %v5374_v14, %v113_v20  ;;  %v3038_v13 = vpack.c.bf16 %v6392_v18, %v6392_v18 }
  0xe2   :  { %v3041_v11 = vpack.c.bf16 %v6396_v21, %v6396_v21 }
  0xe3   :  { %v3039_v8 = vpack.c.bf16 %v6400_v23, %v6400_v23 }
  0xe4   :  { %155 = vrot.lane.b32.xlu1 %v6396_v21, %s6303_s22 }
  0xe5   :  { %v5661_v24 = vpop.f32.mrb[4].mxu0  ;;  %151 = vrot.lane.b32.xlu0 %v6400_v23, %s6303_s22 }
  0xe6   :  { %v126_v25 = vpop.f32.mrb[5].mxu0  ;;  %v6410_v29 = vadd.f32 %v5661_v24, %v5374_v14 }
  0xe7   :  { %v6408_v26 = vadd.f32 %v5374_v14, %v126_v25  ;;  %v5662_v27 = vpop.f32.mrb[6].mxu0 }
  0xe8   :  { %v129_v28 = vpop.f32.mrb[7].mxu0  ;;  %v6415_v31 = vadd.f32 %v5662_v27, %v5374_v14  ;;  %v3044_v25 = vpack.c.bf16 %v6410_v29, %v6410_v29 }
  0xe9   :  { %v6412_v30 = vadd.f32 %v5374_v14, %v129_v28  ;;  %157 = vrot.lane.b32.xlu0 %v6408_v26, %s6303_s22 }
  0xea   :  { %v3045_v20 = vpack.c.bf16 %v6415_v31, %v6415_v31 }
  0xeb   :  { %159 = vrot.lane.b32.xlu1 %v6412_v30, %s6303_s22  ;;  %v3043_v15 = vpack.c.bf16 %v6412_v30, %v6412_v30 }
  0xed   :  { %161 = vrot.lane.b32.xlu0 %v6410_v29, %s6303_s22 }
  0xef   :  { %163 = vrot.lane.b32.xlu1 %v6415_v31, %s6303_s22 }
  0xf1   :  { %221 = vrot.lane.b32.xlu0 %v6392_v18, %s6306_s2 }
  0xf3   :  { %298 = vrot.lane.b32.xlu1 %v6400_v23, %s6306_s2 }
  0xf5   :  { %374 = vrot.lane.b32.xlu0 %v6390_v16, %s6306_s2 }
  0xf7   :  { %165 = vrot.lane.b32.xlu1 %v6392_v18, %s6307_s23 }
  0xf9   :  { %167 = vrot.lane.b32.xlu0 %v6400_v23, %s6307_s23 }
  0xfb   :  { %450 = vrot.lane.b32.xlu1 %v6396_v21, %s6306_s2 }
  0xfd   :  { %169 = vrot.lane.b32.xlu0 %v6390_v16, %s6307_s23 }
  0xff   :  { %171 = vrot.lane.b32.xlu1 %v6396_v21, %s6307_s23 }
 0x101   :  { %526 = vrot.lane.b32.xlu0 %v6408_v26, %s6306_s2 }
 0x103   :  { %602 = vrot.lane.b32.xlu1 %v6412_v30, %s6306_s2 }
 0x105   :  { %173 = vrot.lane.b32.xlu0 %v6408_v26, %s6307_s23 }
 0x107   :  { %175 = vrot.lane.b32.xlu1 %v6412_v30, %s6307_s23 }
 0x109   :  { %678 = vrot.lane.b32.xlu0 %v6410_v29, %s6306_s2 }
 0x10b   :  { %754 = vrot.lane.b32.xlu1 %v6415_v31, %s6306_s2 }
 0x10d   :  { %177 = vrot.lane.b32.xlu0 %v6410_v29, %s6307_s23 }
 0x10f   :  { %179 = vrot.lane.b32.xlu1 %v6415_v31, %s6307_s23 }
 0x152   :  { %v6444_v32 = vpop.permute.xlu1 %153 }
 0x153   :  { %v6446_v33 = vpop.permute.xlu0 %149 }
 0x154   :  { %830 = vrot.lane.b32.xlu0 %v6446_v33, %s6306_s2  ;;  %v3046_v27 = vpack.c.bf16 %v6446_v33, %v6446_v33 }
 0x156   :  { %v6456_v35 = vpop.permute.xlu1 %155 }
 0x157   :  { %v6450_v34 = vpop.permute.xlu0 %151 }
 0x158   :  { %181 = vrot.lane.b32.xlu0 %v6392_v18, %s6308_s24  ;;  %906 = vrot.lane.b32.xlu1 %v6450_v34, %s6306_s2  ;;  %v3047_v24 = vpack.c.bf16 %v6450_v34, %v6450_v34 }
 0x15b   :  { %v6458_v36 = vpop.permute.xlu0 %157 }
 0x15c   :  { %982 = vrot.lane.b32.xlu0 %v6444_v32, %s6306_s2  ;;  %183 = vrot.lane.b32.xlu1 %v6400_v23, %s6308_s24 }
 0x15d   :  { %v6464_v37 = vpop.permute.xlu1 %159 }
 0x15f   :  { %v6466_v38 = vpop.permute.xlu0 %161 }
 0x160   :  { %185 = vrot.lane.b32.xlu0 %v6390_v16, %s6308_s24  ;;  %1058 = vrot.lane.b32.xlu1 %v6456_v35, %s6306_s2 }
 0x161   :  { %v6472_v39 = vpop.permute.xlu1 %163 }
 0x163   :  { %v222_v40 = vpop.permute.xlu0 %221 }
 0x164   :  { %187 = vrot.lane.b32.xlu1 %v6396_v21, %s6308_s24  ;;  %1134 = vrot.lane.b32.xlu0 %v6458_v36, %s6306_s2 }
 0x165   :  { %5664 = vmatpush3.xpose.msk.msra.mxu0 %vm223_vm2, %v222_v40  ;;  %v299_v41 = vpop.permute.xlu1 %298 }
 0x166   :  { %5669 = vmatpush3.xpose.msk.msra.mxu1 %vm223_vm2, %v299_v41  ;;  %5688 = vmatprep.subr.mxu0 %v7712_v22 }
 0x167   :  { %v375_v42 = vpop.permute.xlu0 %374  ;;  %5673 = vmatprep.subr.mxu1 %v7712_v22 }
 0x168   :  { %5666 = vmatmul.mubr.msk.f32.vlgmr.msra.gmra.mrb[8].mxu0 %vm223_vm2, %v6392_v18  ;;  %1210 = vrot.lane.b32.xlu1 %v6464_v37, %s6306_s2  ;;  %v3040_v18 = vpack.c.bf16 %v6390_v16, %v6390_v16 }
 0x169   :  { %189 = vrot.lane.b32.xlu0 %v6408_v26, %s6308_s24  ;;  %5671 = vmatmul.mubr.msk.f32.vlgmr.msra.gmra.mrb[0].mxu1 %vm223_vm2, %v6400_v23  ;;  %v6490_v43 = vpop.permute.xlu1 %165 }
 0x16a   :  { %5674 = vmatpush3.xpose.msk.msra.mxu1 %vm223_vm2, %v375_v42  ;;  %5675 = vmatprep.mubr.msk.f32.mxu1 %vm6305_vm1, %v7712_v22 }
 0x16b   :  { %v6495_v44 = vpop.permute.xlu0 %167  ;;  %5678 = vmatprep.subr.mxu1 %v7712_v22  ;;  %5690 = vmatprep.mubr.msk.f32.mxu0 %vm6305_vm1, %v7712_v22 }
 0x16c   :  { %191 = vrot.lane.b32.xlu1 %v6412_v30, %s6308_s24  ;;  %v3055_v28 = vpack.c.bf16 %v6495_v44, %v6495_v44 }
 0x16d   :  { %1286 = vrot.lane.b32.xlu0 %v6466_v38, %s6306_s2  ;;  %v451_v45 = vpop.permute.xlu1 %450  ;;  %5676 = vmatmul.mubr.msk.f32.vlgmr.msra.gmra.mrb[2].mxu1 %vm223_vm2, %v6390_v16 }
 0x16e   :  { %5679 = vmatpush3.xpose.msk.msra.mxu1 %vm223_vm2, %v451_v45  ;;  %5680 = vmatprep.mubr.msk.f32.mxu1 %vm6305_vm1, %v7712_v22 }
 0x16f   :  { %v6509_v46 = vpop.permute.xlu0 %169  ;;  %5683 = vmatprep.subr.mxu1 %v7712_v22 }
 0x170   :  { %1362 = vrot.lane.b32.xlu1 %v6472_v39, %s6306_s2 }
 0x171   :  { %193 = vrot.lane.b32.xlu0 %v6410_v29, %s6308_s24  ;;  %v6516_v47 = vpop.permute.xlu1 %171  ;;  %5681 = vmatmul.mubr.msk.f32.vlgmr.msra.gmra.mrb[4].mxu1 %vm223_vm2, %v6396_v21  ;;  %v3042_v21 = vpack.c.bf16 %v6408_v26, %v6408_v26 }
 0x172   :  { %5685 = vmatprep.mubr.msk.f32.mxu1 %vm6305_vm1, %v7712_v22 }
 0x173   :  { %v527_v48 = vpop.permute.xlu0 %526 }
 0x174   :  { %195 = vrot.lane.b32.xlu1 %v6415_v31, %s6308_s24  ;;  %5684 = vmatpush3.xpose.msk.msra.mxu1 %vm223_vm2, %v527_v48 }
 0x175   :  { %1438 = vrot.lane.b32.xlu0 %v6490_v43, %s6306_s2  ;;  %v603_v49 = vpop.permute.xlu1 %602  ;;  %5693 = vmatprep.subr.mxu1 %v7712_v22 }
 0x176   :  { %5689 = vmatpush3.xpose.msk.msra.mxu0 %vm223_vm2, %v603_v49 }
 0x177   :  { %5686 = vmatmul.mubr.msk.f32.vlgmr.msra.gmra.mrb[6].mxu1 %vm223_vm2, %v6408_v26  ;;  %v6531_v50 = vpop.permute.xlu0 %173  ;;  %5698 = vmatprep.subr.mxu0 %v7712_v22  ;;  %v3049_v26 = vpack.c.bf16 %v6456_v35, %v6456_v35 }
 0x178   :  { %1514 = vrot.lane.b32.xlu1 %v6495_v44, %s6306_s2  ;;  %5695 = vmatprep.mubr.msk.f32.mxu1 %vm6305_vm1, %v7712_v22  ;;  %v3058_v40 = vpack.c.bf16 %v6531_v50, %v6531_v50 }
 0x179   :  { %1590 = vrot.lane.b32.xlu0 %v6509_v46, %s6306_s2  ;;  %v6540_v51 = vpop.permute.xlu1 %175  ;;  %5691 = vmatmul.mubr.msk.f32.vlgmr.msra.gmra.mrb[10].mxu0 %vm223_vm2, %v6412_v30  ;;  %v3057_v30 = vpack.c.bf16 %v6516_v47, %v6516_v47 }
 0x17a   :  { %5700 = vmatprep.mubr.msk.f32.mxu0 %vm6305_vm1, %v7712_v22 }
 0x17b   :  { %v679_v52 = vpop.permute.xlu0 %678 }
 0x17c   :  { %1666 = vrot.lane.b32.xlu1 %v6516_v47, %s6306_s2  ;;  %5694 = vmatpush3.xpose.msk.msra.mxu1 %vm223_vm2, %v679_v52 }
 0x17d   :  { %1742 = vrot.lane.b32.xlu0 %v6531_v50, %s6306_s2  ;;  %v755_v53 = vpop.permute.xlu1 %754  ;;  %5703 = vmatprep.subr.mxu1 %v7712_v22 }
 0x17e   :  { %5699 = vmatpush3.xpose.msk.msra.mxu0 %vm223_vm2, %v755_v53 }
 0x17f   :  { %5696 = vmatmul.mubr.msk.f32.vlgmr.msra.gmra.mrb[8].mxu1 %vm223_vm2, %v6410_v29  ;;  %v6555_v54 = vpop.permute.xlu0 %177  ;;  %5708 = vmatprep.subr.mxu0 %v7712_v22  ;;  %v3048_v29 = vpack.c.bf16 %v6444_v32, %v6444_v32 }
 0x180   :  { %1818 = vrot.lane.b32.xlu1 %v6540_v51, %s6306_s2  ;;  %5705 = vmatprep.mubr.msk.f32.mxu1 %vm6305_vm1, %v7712_v22 }
 0x181   :  { %1894 = vrot.lane.b32.xlu0 %v6555_v54, %s6306_s2  ;;  %5701 = vmatmul.mubr.msk.f32.vlgmr.msra.gmra.mrb[12].mxu0 %vm223_vm2, %v6415_v31  ;;  %v6568_v55 = vpop.permute.xlu1 %179  ;;  %v3052_v31 = vpack.c.bf16 %v6466_v38, %v6466_v38 }
 0x182   :  { %5710 = vmatprep.mubr.msk.f32.mxu0 %vm6305_vm1, %v7712_v22 }
 0x184   :  { %1970 = vrot.lane.b32.xlu1 %v6568_v55, %s6306_s2 }
 0x1c6   :  { %v831_v56 = vpop.permute.xlu0 %830 }
 0x1c7   :  { %5704 = vmatpush3.xpose.msk.msra.mxu1 %vm223_vm2, %v831_v56 }
 0x1c8   :  { %5713 = vmatprep.subr.mxu1 %v7712_v22 }
 0x1ca   :  { %v907_v57 = vpop.permute.xlu1 %906  ;;  %5706 = vmatmul.mubr.msk.f32.vlgmr.msra.gmra.mrb[10].mxu1 %vm223_vm2, %v6446_v33  ;;  %v6576_v58 = vpop.permute.xlu0 %181  ;;  %v3053_v33 = vpack.c.bf16 %v6472_v39, %v6472_v39 }
 0x1cb   :  { %5709 = vmatpush3.xpose.msk.msra.mxu0 %vm223_vm2, %v907_v57  ;;  %2046 = vrot.lane.b32.xlu0 %v6576_v58, %s6306_s2 }
 0x1cc   :  { %5715 = vmatprep.mubr.msk.f32.mxu1 %vm6305_vm1, %v7712_v22  ;;  %5718 = vmatprep.subr.mxu0 %v7712_v22 }
 0x1ce   :  { %v6584_v59 = vpop.permute.xlu1 %183  ;;  %5711 = vmatmul.mubr.msk.f32.vlgmr.msra.gmra.mrb[14].mxu0 %vm223_vm2, %v6450_v34  ;;  %v983_v60 = vpop.permute.xlu0 %982  ;;  %v3051_v34 = vpack.c.bf16 %v6464_v37, %v6464_v37 }
 0x1cf   :  { %2122 = vrot.lane.b32.xlu1 %v6584_v59, %s6306_s2  ;;  %5714 = vmatpush3.xpose.msk.msra.mxu1 %vm223_vm2, %v983_v60 }
 0x1d0   :  { %5720 = vmatprep.mubr.msk.f32.mxu0 %vm6305_vm1, %v7712_v22  ;;  %5723 = vmatprep.subr.mxu1 %v7712_v22 }
 0x1d2   :  { %v1059_v61 = vpop.permute.xlu1 %1058  ;;  %5716 = vmatmul.mubr.msk.f32.vlgmr.msra.gmra.mrb[12].mxu1 %vm223_vm2, %v6444_v32  ;;  %v6596_v62 = vpop.permute.xlu0 %185  ;;  %v3054_v32 = vpack.c.bf16 %v6490_v43, %v6490_v43 }
 0x1d3   :  { %5719 = vmatpush3.xpose.msk.msra.mxu0 %vm223_vm2, %v1059_v61  ;;  %2198 = vrot.lane.b32.xlu0 %v6596_v62, %s6306_s2 }
 0x1d4   :  { %5725 = vmatprep.mubr.msk.f32.mxu1 %vm6305_vm1, %v7712_v22  ;;  %5728 = vmatprep.subr.mxu0 %v7712_v22 }
 0x1d6   :  { %v6604_v63 = vpop.permute.xlu1 %187  ;;  %5721 = vmatmul.mubr.msk.f32.vlgmr.msra.gmra.mrb[16].mxu0 %vm223_vm2, %v6456_v35  ;;  %v1135_v0 = vpop.permute.xlu0 %1134  ;;  %v3056_v35 = vpack.c.bf16 %v6509_v46, %v6509_v46 }
 0x1d7   :  { %2274 = vrot.lane.b32.xlu1 %v6604_v63, %s6306_s2  ;;  %5724 = vmatpush3.xpose.msk.msra.mxu1 %vm223_vm2, %v1135_v0 }
 0x1d8   :  { %5730 = vmatprep.mubr.msk.f32.mxu0 %vm6305_vm1, %v7712_v22  ;;  %5733 = vmatprep.subr.mxu1 %v7712_v22 }
 0x1da   :  { %v1211_v1 = vpop.permute.xlu1 %1210  ;;  %5726 = vmatmul.mubr.msk.f32.vlgmr.msra.gmra.mrb[14].mxu1 %vm223_vm2, %v6458_v36 }
 0x1db   :  { %v6616_v2 = vpop.permute.xlu0 %189  ;;  %5729 = vmatpush3.xpose.msk.msra.mxu0 %vm223_vm2, %v1211_v1  ;;  %5735 = vmatprep.mubr.msk.f32.mxu1 %vm6305_vm1, %v7712_v22 }
 0x1dc   :  { %2350 = vrot.lane.b32.xlu0 %v6616_v2, %s6306_s2  ;;  %5738 = vmatprep.subr.mxu0 %v7712_v22 }
 0x1de   :  { %v6624_v3 = vpop.permute.xlu1 %191  ;;  %5731 = vmatmul.mubr.msk.f32.vlgmr.msra.gmra.mrb[18].mxu0 %vm223_vm2, %v6464_v37  ;;  %v3050_v37 = vpack.c.bf16 %v6458_v36, %v6458_v36 }
 0x1df   :  { %v1287_v4 = vpop.permute.xlu0 %1286  ;;  %2426 = vrot.lane.b32.xlu1 %v6624_v3, %s6306_s2  ;;  %5740 = vmatprep.mubr.msk.f32.mxu0 %vm6305_vm1, %v7712_v22 }
 0x1e0   :  { %5734 = vmatpush3.xpose.msk.msra.mxu1 %vm223_vm2, %v1287_v4 }
 0x1e1   :  { %5743 = vmatprep.subr.mxu1 %v7712_v22 }
 0x1e2   :  { %v1363_v5 = vpop.permute.xlu1 %1362 }
 0x1e3   :  { %5736 = vmatmul.mubr.msk.f32.vlgmr.msra.gmra.mrb[16].mxu1 %vm223_vm2, %v6466_v38  ;;  %v6636_v6 = vpop.permute.xlu0 %193  ;;  %5739 = vmatpush3.xpose.msk.msra.mxu0 %vm223_vm2, %v1363_v5  ;;  %v3059_v38 = vpack.c.bf16 %v6540_v51, %v6540_v51 }
 0x1e4   :  { %2502 = vrot.lane.b32.xlu0 %v6636_v6, %s6306_s2  ;;  %5745 = vmatprep.mubr.msk.f32.mxu1 %vm6305_vm1, %v7712_v22 }
 0x1e5   :  { %5748 = vmatprep.subr.mxu0 %v7712_v22 }
 0x1e6   :  { %v6644_v7 = vpop.permute.xlu1 %195  ;;  %5741 = vmatmul.mubr.msk.f32.vlgmr.msra.gmra.mrb[20].mxu0 %vm223_vm2, %v6472_v39  ;;  %v3060_v39 = vpack.c.bf16 %v6555_v54, %v6555_v54 }
 0x1e7   :  { %v1439_v9 = vpop.permute.xlu0 %1438  ;;  %2578 = vrot.lane.b32.xlu1 %v6644_v7, %s6306_s2  ;;  %5750 = vmatprep.mubr.msk.f32.mxu0 %vm6305_vm1, %v7712_v22 }
 0x1e8   :  { %3121 = vrot.lane.b32.xlu0 %v3039_v8, %s6309_s25  ;;  %5744 = vmatpush3.xpose.msk.msra.mxu1 %vm223_vm2, %v1439_v9 }
 0x1e9   :  { %5753 = vmatprep.subr.mxu1 %v7712_v22 }
 0x1ea   :  { %v1515_v10 = vpop.permute.xlu1 %1514 }
 0x1eb   :  { %5746 = vmatmul.mubr.msk.f32.vlgmr.msra.gmra.mrb[18].mxu1 %vm223_vm2, %v6490_v43  ;;  %v1591_v12 = vpop.permute.xlu0 %1590  ;;  %5749 = vmatpush3.xpose.msk.msra.mxu0 %vm223_vm2, %v1515_v10 }
 0x1ec   :  { %3219 = vrot.lane.b32.xlu0 %v3041_v11, %s6309_s25  ;;  %5754 = vmatpush3.xpose.msk.msra.mxu1 %vm223_vm2, %v1591_v12 }
 0x1ed   :  { %3071 = vrot.lane.b32.xlu1 %v3038_v13, %s6309_s25  ;;  %5755 = vmatprep.mubr.msk.f32.mxu1 %vm6305_vm1, %v7712_v22 }
 0x1ee   :  { %5751 = vmatmul.mubr.msk.f32.vlgmr.msra.gmra.mrb[22].mxu0 %vm223_vm2, %v6495_v44  ;;  %5758 = vmatprep.subr.mxu0 %v7712_v22  ;;  %v1667_v14 = vpop.permute.xlu1 %1666 }
 0x1ef   :  { %5756 = vmatmul.mubr.msk.f32.vlgmr.msra.gmra.mrb[20].mxu1 %vm223_vm2, %v6509_v46  ;;  %5763 = vmatprep.subr.mxu1 %v7712_v22  ;;  %v1743_v17 = vpop.permute.xlu0 %1742 }
 0x1f0   :  { %5759 = vmatpush3.xpose.msk.msra.mxu0 %vm223_vm2, %v1667_v14  ;;  %3317 = vrot.lane.b32.xlu0 %v3043_v15, %s6309_s25 }
 0x1f1   :  { %5764 = vmatpush3.xpose.msk.msra.mxu1 %vm223_vm2, %v1743_v17  ;;  %3170 = vrot.lane.b32.xlu1 %v3040_v18, %s6309_s25 }
 0x1f2   :  { %5760 = vmatprep.mubr.msk.f32.mxu0 %vm6305_vm1, %v7712_v22  ;;  %5765 = vmatprep.mubr.msk.f32.mxu1 %vm6305_vm1, %v7712_v22  ;;  %v1819_v19 = vpop.permute.xlu1 %1818 }
 0x1f3   :  { %5761 = vmatmul.mubr.msk.f32.vlgmr.msra.gmra.mrb[24].mxu0 %vm223_vm2, %v6516_v47  ;;  %5768 = vmatprep.subr.mxu0 %v7712_v22  ;;  %v1895_v16 = vpop.permute.xlu0 %1894 }
 0x1f4   :  { %5766 = vmatmul.mubr.msk.f32.vlgmr.msra.gmra.mrb[22].mxu1 %vm223_vm2, %v6531_v50  ;;  %5773 = vmatprep.subr.mxu1 %v7712_v22 }
 0x1f5   :  { %5769 = vmatpush3.xpose.msk.msra.mxu0 %vm223_vm2, %v1819_v19  ;;  %3415 = vrot.lane.b32.xlu0 %v3045_v20, %s6309_s25 }
 0x1f6   :  { %5774 = vmatpush3.xpose.msk.msra.mxu1 %vm223_vm2, %v1895_v16  ;;  %3268 = vrot.lane.b32.xlu1 %v3042_v21, %s6309_s25  ;;  %v1971_v23 = vpop.permute.xlu1 %1970 }
 0x1f7   :  { %5770 = vmatprep.mubr.msk.f32.mxu0 %vm6305_vm1, %v7712_v22  ;;  %5775 = vmatprep.mubr.msk.f32.mxu1 %vm6305_vm1, %v7712_v22 }
 0x1f8   :  { %5771 = vmatmul.mubr.msk.f32.vlgmr.msra.gmra.mrb[26].mxu0 %vm223_vm2, %v6540_v51  ;;  %5778 = vmatprep.subr.mxu0 %v7712_v22 }
 0x1f9   :  { %5776 = vmatmul.mubr.msk.f32.vlgmr.msra.gmra.mrb[24].mxu1 %vm223_vm2, %v6555_v54  ;;  %5779 = vmatpush3.xpose.msk.msra.mxu0 %vm223_vm2, %v1971_v23 }
 0x1fa   :  { %3513 = vrot.lane.b32.xlu0 %v3047_v24, %s6309_s25  ;;  %3366 = vrot.lane.b32.xlu1 %v3044_v25, %s6309_s25 }
 0x1fb   :  { %5780 = vmatprep.mubr.msk.f32.mxu0 %vm6305_vm1, %v7712_v22  ;;  %5783 = vmatprep.subr.mxu1 %v7712_v22 }
 0x1fc   :  { %5781 = vmatmul.mubr.msk.f32.vlgmr.msra.gmra.mrb[28].mxu0 %vm223_vm2, %v6568_v55  ;;  %5785 = vmatprep.mubr.msk.f32.mxu1 %vm6305_vm1, %v7712_v22 }
 0x1fd   :  { %5788 = vmatprep.subr.mxu0 %v7712_v22  ;;  %5790 = vmatprep.mubr.msk.f32.mxu0 %vm6305_vm1, %v7712_v22 }
 0x1fe   :  { %3611 = vrot.lane.b32.xlu0 %v3049_v26, %s6309_s25  ;;  %3464 = vrot.lane.b32.xlu1 %v3046_v27, %s6309_s25 }
 0x202   :  { %3905 = vrot.lane.b32.xlu0 %v3055_v28, %s6309_s25  ;;  %3562 = vrot.lane.b32.xlu1 %v3048_v29, %s6309_s25 }
 0x206   :  { %4003 = vrot.lane.b32.xlu0 %v3057_v30, %s6309_s25  ;;  %3758 = vrot.lane.b32.xlu1 %v3052_v31, %s6309_s25 }
 0x20a   :  { %3807 = vrot.lane.b32.xlu0 %v3053_v33, %s6309_s25  ;;  %3856 = vrot.lane.b32.xlu1 %v3054_v32, %s6309_s25 }
 0x20e   :  { %3709 = vrot.lane.b32.xlu0 %v3051_v34, %s6309_s25  ;;  %3954 = vrot.lane.b32.xlu1 %v3056_v35, %s6309_s25 }
 0x212   :  { %4101 = vrot.lane.b32.xlu0 %v3059_v38, %s6309_s25  ;;  %4150 = vrot.lane.b32.xlu1 %v3060_v39, %s6309_s25 }
 0x216   :  { %3660 = vrot.lane.b32.xlu1 %v3050_v37, %s6309_s25 }
 0x21a   :  { %4052 = vrot.lane.b32.xlu1 %v3058_v40, %s6309_s25  ;;  %v3062_v40 = vpack.c.bf16 %v6576_v58, %v6576_v58 }
 0x23b   :  { %v6769_v41 = vpop.f32.mrb[8].mxu0 }
 0x23c   :  { %v5667_v42 = vpop.f32.mrb[9].mxu0  ;;  %v6771_v43 = vpop.f32.mrb[0].mxu1  ;;  %v2654_v44 = vsel %vm223_vm2, %v6769_v41, -inf }
 0x23d   :  { %2655 = vmax.xlane.f32.xlu0 %v2654_v44  ;;  %v5672_v45 = vpop.f32.mrb[1].mxu1  ;;  %v2047_v46 = vpop.permute.xlu0 %2046  ;;  %v2657_v36 = vsel %vm223_vm2, %v6771_v43, -inf }
 0x23e   :  { %5784 = vmatpush3.xpose.msk.msra.mxu1 %vm223_vm2, %v2047_v46  ;;  %2658 = vmax.xlane.f32.xlu1 %v2657_v36 }
 0x23f   :  { %5793 = vmatprep.subr.mxu1 %v7712_v22 }
 0x240   :  { %v6779_v47 = vpop.f32.mrb[2].mxu1 }
 0x241   :  { %v5677_v48 = vpop.f32.mrb[3].mxu1  ;;  %v2123_v49 = vpop.permute.xlu1 %2122  ;;  %5786 = vmatmul.mubr.msk.f32.vlgmr.msra.gmra.mrb[26].mxu1 %vm223_vm2, %v6576_v58  ;;  %v2660_v50 = vsel %vm223_vm2, %v6779_v47, -inf }
 0x242   :  { %5789 = vmatpush3.xpose.msk.msra.mxu0 %vm223_vm2, %v2123_v49  ;;  %2661 = vmax.xlane.f32.xlu0 %v2660_v50  ;;  %v3061_v48 = vpack.c.bf16 %v6568_v55, %v6568_v55 }
 0x243   :  { %5795 = vmatprep.mubr.msk.f32.mxu1 %vm6305_vm1, %v7712_v22  ;;  %5798 = vmatprep.subr.mxu0 %v7712_v22 }
 0x244   :  { %v6789_v51 = vpop.f32.mrb[4].mxu1 }
 0x245   :  { %v5682_v52 = vpop.f32.mrb[5].mxu1  ;;  %5791 = vmatmul.mubr.msk.f32.vlgmr.msra.gmra.mrb[30].mxu0 %vm223_vm2, %v6584_v59  ;;  %v2199_v53 = vpop.permute.xlu0 %2198  ;;  %v2663_v54 = vsel %vm223_vm2, %v6789_v51, -inf }
 0x246   :  { %2664 = vmax.xlane.f32.xlu0 %v2663_v54  ;;  %5794 = vmatpush3.xpose.msk.msra.mxu1 %vm223_vm2, %v2199_v53 }
 0x247   :  { %5800 = vmatprep.mubr.msk.f32.mxu0 %vm6305_vm1, %v7712_v22  ;;  %5803 = vmatprep.subr.mxu1 %v7712_v22 }
 0x249   :  { %v2275_v56 = vpop.permute.xlu1 %2274  ;;  %5796 = vmatmul.mubr.msk.f32.vlgmr.msra.gmra.mrb[28].mxu1 %vm223_vm2, %v6596_v62 }
 0x24a   :  { %v6801_v57 = vpop.f32.mrb[6].mxu1  ;;  %5799 = vmatpush3.xpose.msk.msra.mxu0 %vm223_vm2, %v2275_v56  ;;  %5805 = vmatprep.mubr.msk.f32.mxu1 %vm6305_vm1, %v7712_v22 }
 0x24b   :  { %v5687_v60 = vpop.f32.mrb[7].mxu1  ;;  %v2666_v61 = vsel %vm223_vm2, %v6801_v57, -inf  ;;  %5808 = vmatprep.subr.mxu0 %v7712_v22 }
 0x24c   :  { %v6809_v0 = vpop.f32.mrb[10].mxu0  ;;  %2667 = vmax.xlane.f32.xlu1 %v2666_v61 }
 0x24d   :  { %v5692_v1 = vpop.f32.mrb[11].mxu0  ;;  %5801 = vmatmul.mubr.msk.f32.vlgmr.msra.gmra.mrb[32].mxu0 %vm223_vm2, %v6604_v63  ;;  %v2669_v4 = vsel %vm223_vm2, %v6809_v0, -inf }
 0x24e   :  { %v2351_v5 = vpop.permute.xlu0 %2350  ;;  %2670 = vmax.xlane.f32.xlu0 %v2669_v4  ;;  %5810 = vmatprep.mubr.msk.f32.mxu0 %vm6305_vm1, %v7712_v22 }
 0x24f   :  { %5804 = vmatpush3.xpose.msk.msra.mxu1 %vm223_vm2, %v2351_v5 }
 0x250   :  { %5813 = vmatprep.subr.mxu1 %v7712_v22 }
 0x251   :  { %v2427_v8 = vpop.permute.xlu1 %2426 }
 0x252   :  { %5806 = vmatmul.mubr.msk.f32.vlgmr.msra.gmra.mrb[30].mxu1 %vm223_vm2, %v6616_v2  ;;  %v6821_v9 = vpop.f32.mrb[8].mxu1  ;;  %5809 = vmatpush3.xpose.msk.msra.mxu0 %vm223_vm2, %v2427_v8 }
 0x253   :  { %v5697_v10 = vpop.f32.mrb[9].mxu1  ;;  %v2672_v11 = vsel %vm223_vm2, %v6821_v9, -inf  ;;  %5815 = vmatprep.mubr.msk.f32.mxu1 %vm6305_vm1, %v7712_v22  ;;  %5818 = vmatprep.subr.mxu0 %v7712_v22 }
 0x254   :  { %v6829_v12 = vpop.f32.mrb[12].mxu0  ;;  %2673 = vmax.xlane.f32.xlu1 %v2672_v11 }
 0x255   :  { %v5702_v13 = vpop.f32.mrb[13].mxu0  ;;  %5811 = vmatmul.mubr.msk.f32.vlgmr.msra.gmra.mrb[34].mxu0 %vm223_vm2, %v6624_v3  ;;  %v2675_v14 = vsel %vm223_vm2, %v6829_v12, -inf }
 0x256   :  { %v2503_v15 = vpop.permute.xlu0 %2502  ;;  %2676 = vmax.xlane.f32.xlu0 %v2675_v14  ;;  %5820 = vmatprep.mubr.msk.f32.mxu0 %vm6305_vm1, %v7712_v22 }
 0x257   :  { %5814 = vmatpush3.xpose.msk.msra.mxu1 %vm223_vm2, %v2503_v15 }
 0x258   :  { %5823 = vmatprep.subr.bf16.mxu1 %v7712_v22 }
 0x259   :  { %v2579_v17 = vpop.permute.xlu1 %2578 }
 0x25a   :  { %5816 = vmatmul.mubr.msk.f32.vlgmr.msra.gmra.mrb[32].mxu1 %vm223_vm2, %v6636_v6  ;;  %v3122_v18 = vpop.permute.xlu0 %3121  ;;  %5819 = vmatpush3.xpose.msk.msra.mxu0 %vm223_vm2, %v2579_v17 }
 0x25b   :  { %5829 = vmatprep.subr.bf16.mxu0 %v7712_v22  ;;  %5825 = vmatprep.mubr.msk.bf16.mxu1 %vm6305_vm1, %v7712_v22  ;;  %v3127_v19 = vsel %vm3076_vm3, %v3122_v18, 0 }
 0x25d   :  { %5821 = vmatmul.mubr.msk.f32.vlgmr.msra.gmra.mrb[36].mxu0 %vm223_vm2, %v6644_v7 }
 0x25e   :  { %5830 = vmatpush3.bf16.msra.mxu0 %v3127_v19  ;;  %5831 = vmatprep.mubr.msk.bf16.mxu0 %vm6305_vm1, %v7712_v22  ;;  %v6901_v11 = vpop.permute.xlu0 %3219 }
 0x25f   :  { %v3072_v16 = vpop.permute.xlu1 %3071  ;;  %5841 = vmatprep.subr.bf16.mxu0 %v7712_v22 }
 0x260   :  { %v3078_v20 = vsel %vm3076_vm3, %v3072_v16, 0 }
 0x261   :  { %5824 = vmatpush3.bf16.msra.mxu1 %v3078_v20 }
 0x262   :  { %5835 = vmatprep.subr.bf16.mxu1 %v7712_v22  ;;  %v6907_v15 = vpop.permute.xlu0 %3317 }
 0x263   :  { %v6899_v10 = vpop.permute.xlu1 %3170 }
 0x268   :  { %v6903_v13 = vpop.permute.xlu1 %3268 }
 0x26c   :  { %v6913_v19 = vpop.permute.xlu1 %3366 }
 0x29d   :  { %v6853_v21 = vpop.f32.mrb[10].mxu1 }
 0x29e   :  { %v5707_v23 = vpop.f32.mrb[11].mxu1  ;;  %v2678_v24 = vsel %vm223_vm2, %v6853_v21, -inf }
 0x29f   :  { %2679 = vmax.xlane.f32.xlu1 %v2678_v24  ;;  %v6919_v23 = vpop.permute.xlu0 %3415  ;;  %v6921_v24 = vpop.permute.xlu1 %3464 }
 0x2a1   :  { %v6857_v25 = vpop.f32.mrb[14].mxu0 }
 0x2a2   :  { %v5712_v26 = vpop.f32.mrb[15].mxu0  ;;  %v2681_v27 = vsel %vm223_vm2, %v6857_v25, -inf }
 0x2a3   :  { %2682 = vmax.xlane.f32.xlu0 %v2681_v27 }
 0x2a5   :  { %v6861_v28 = vpop.f32.mrb[12].mxu1 }
 0x2a6   :  { %v5717_v29 = vpop.f32.mrb[13].mxu1  ;;  %v2684_v30 = vsel %vm223_vm2, %v6861_v28, -inf }
 0x2a7   :  { %2685 = vmax.xlane.f32.xlu1 %v2684_v30  ;;  %v6927_v29 = vpop.permute.xlu0 %3513 }
 0x2a9   :  { %v6865_v31 = vpop.f32.mrb[16].mxu0 }
 0x2aa   :  { %v5722_v33 = vpop.f32.mrb[17].mxu0  ;;  %v2687_v32 = vsel %vm223_vm2, %v6865_v31, -inf }
 0x2ab   :  { %2688 = vmax.xlane.f32.xlu0 %v2687_v32  ;;  %v6933_v32 = vpop.permute.xlu1 %3562 }
 0x2ad   :  { %v6869_v34 = vpop.f32.mrb[14].mxu1 }
 0x2ae   :  { %v5727_v35 = vpop.f32.mrb[15].mxu1  ;;  %v2690_v14 = vsel %vm223_vm2, %v6869_v34, -inf }
 0x2b1   :  { %v6871_v38 = vpop.f32.mrb[18].mxu0 }
 0x2b2   :  { %v5732_v39 = vpop.f32.mrb[19].mxu0  ;;  %v2693_v17 = vsel %vm223_vm2, %v6871_v38, -inf }
 0x2b6   :  { %v6873_v37 = vpop.f32.mrb[16].mxu1 }
 0x2b7   :  { %v5737_v42 = vpop.f32.mrb[17].mxu1  ;;  %v2696_v18 = vsel %vm223_vm2, %v6873_v37, -inf }
 0x2b8   :  { %4248 = vrot.lane.b32.xlu1 %v3062_v40, %s6309_s25  ;;  %v6939_v40 = vpop.permute.xlu0 %3611  ;;  %v6941_v42 = vpop.permute.xlu1 %3758 }
 0x2b9   :  { %v6878_v44 = vpop.f32.mrb[20].mxu0  ;;  %7714 = vst [vmem:[#allocation2_spill] sm:$0xff] %v6941_v42 }
 0x2ba   :  { %v5742_v45 = vpop.f32.mrb[21].mxu0  ;;  %v2699_v16 = vsel %vm223_vm2, %v6878_v44, -inf }
 0x2be   :  { %v6880_v46 = vpop.f32.mrb[18].mxu1 }
 0x2bf   :  { %v5747_v36 = vpop.f32.mrb[19].mxu1  ;;  %v2702_v20 = vsel %vm223_vm2, %v6880_v46, -inf }
 0x2c0   :  { %v6945_v36 = vpop.permute.xlu0 %3905 }
 0x2c1   :  { %v6884_v49 = vpop.f32.mrb[22].mxu0  ;;  %4199 = vrot.lane.b32.xlu0 %v3061_v48, %s6309_s25  ;;  %7715 = vst [vmem:[#allocation3_spill] sm:$0xff] %v6945_v36  ;;  %v6947_v48 = vpop.permute.xlu1 %3856 }
 0x2c2   :  { %v6887_v50 = vpop.f32.mrb[20].mxu1  ;;  %v5752_v52 = vpop.f32.mrb[23].mxu0  ;;  %v2705_v26 = vsel %vm223_vm2, %v6884_v49, -inf  ;;  %7716 = vst [vmem:[#allocation4_spill] sm:$0xff] %v6947_v48 }
 0x2c3   :  { %v5757_v58 = vpop.f32.mrb[21].mxu1  ;;  %v2708_v27 = vsel %vm223_vm2, %v6887_v50, -inf }
 0x2c4   :  { %v6949_v52 = vpop.permute.xlu0 %4003 }
 0x2c5   :  { %7717 = vst [vmem:[#allocation5_spill] sm:$0xff] %v6949_v52  ;;  %v6951_v58 = vpop.permute.xlu1 %3954 }
 0x2c6   :  { %v6889_v53 = vpop.f32.mrb[24].mxu0  ;;  %7718 = vst [vmem:[#allocation6_spill] sm:$0xff] %v6951_v58 }
 0x2c7   :  { %v6891_v54 = vpop.f32.mrb[22].mxu1  ;;  %v5762_v56 = vpop.f32.mrb[25].mxu0  ;;  %v2711_v30 = vsel %vm223_vm2, %v6889_v53, -inf }
 0x2c8   :  { %v5767_v60 = vpop.f32.mrb[23].mxu1  ;;  %v2714_v33 = vsel %vm223_vm2, %v6891_v54, -inf  ;;  %v6953_v56 = vpop.permute.xlu0 %3807 }
 0x2c9   :  { %7719 = vst [vmem:[#allocation7_spill] sm:$0xff] %v6953_v56  ;;  %v6955_v60 = vpop.permute.xlu1 %4150 }
 0x2ca   :  { %7720 = vst [vmem:[#allocation8_spill] sm:$0xff] %v6955_v60 }
 0x2cb   :  { %v6893_v61 = vpop.f32.mrb[26].mxu0 }
 0x2cc   :  { %v6895_v1 = vpop.f32.mrb[24].mxu1  ;;  %v5772_v4 = vpop.f32.mrb[27].mxu0  ;;  %v2717_v35 = vsel %vm223_vm2, %v6893_v61, -inf }
 0x2cd   :  { %v5777_v55 = vpop.f32.mrb[25].mxu1  ;;  %v2720_v39 = vsel %vm223_vm2, %v6895_v1, -inf  ;;  %v6957_v4 = vpop.permute.xlu0 %3709 }
 0x2ce   :  { %7721 = vst [vmem:[#allocation9_spill] sm:$0xff] %v6957_v4  ;;  %v6959_v55 = vpop.permute.xlu1 %3660 }
 0x2cf   :  { %v6897_v5 = vpop.f32.mrb[28].mxu0 }
 0x2d0   :  { %v5782_v8 = vpop.f32.mrb[29].mxu0  ;;  %v2723_v45 = vsel %vm223_vm2, %v6897_v5, -inf }
 0x2d1   :  { %v6961_v8 = vpop.permute.xlu0 %4101 }
 0x2d2   :  { %7722 = vst [vmem:[#allocation10_spill] sm:$0xff] %v6961_v8 }
 0x2dc   :  { %2691 = vmax.xlane.f32.xlu1 %v2690_v14  ;;  %v6963_v14 = vpop.permute.xlu1 %4052 }
 0x2dd   :  { %7723 = vst [vmem:[#allocation11_spill] sm:$0xff] %v6963_v14 }
 0x2e0   :  { %2694 = vmax.xlane.f32.xlu0 %v2693_v17  ;;  %2697 = vmax.xlane.f32.xlu1 %v2696_v18  ;;  %v2656_v17 = vpop.xlane.xlu0 %2655 }
 0x2e4   :  { %2700 = vmax.xlane.f32.xlu0 %v2699_v16  ;;  %2703 = vmax.xlane.f32.xlu1 %v2702_v20  ;;  %v2750_v16 = vsub.f32 %v6769_v41, %v2656_v17  ;;  %v2659_v20 = vpop.xlane.xlu1 %2658 }
 0x2e8   :  { %2706 = vmax.xlane.f32.xlu0 %v2705_v26  ;;  %2709 = vmax.xlane.f32.xlu1 %v2708_v27 }
 0x2ec   :  { %2712 = vmax.xlane.f32.xlu0 %v2711_v30  ;;  %2715 = vmax.xlane.f32.xlu1 %v2714_v33  ;;  %v2662_v30 = vpop.xlane.xlu0 %2661  ;;  %v2751_v33 = vsub.f32 %v6771_v43, %v2659_v20  ;;  %v2668_v43 = vpop.xlane.xlu1 %2667 }
 0x2ed   :  { %v2752_v41 = vsub.f32 %v6779_v47, %v2662_v30 }
 0x2ee   :  { %v2784_v60 = vmul.f32 1.442695, %v2751_v33 }
 0x2f0   :  { %2718 = vmax.xlane.f32.xlu0 %v2717_v35  ;;  %2721 = vmax.xlane.f32.xlu1 %v2720_v39  ;;  %v2782_v39 = vmul.f32 1.442695, %v2750_v16  ;;  %v2665_v17 = vpop.xlane.xlu0 %2664  ;;  %v2674_v30 = vpop.xlane.xlu1 %2673 }
 0x2f1   :  { %v2753_v16 = vsub.f32 %v6789_v51, %v2665_v17 }
 0x2f2   :  { %6135 = vpow2.f32 %v2782_v39 }
 0x2f3   :  { %6137 = vpow2.f32 %v2784_v60  ;;  %v2788_v39 = vmul.f32 1.442695, %v2753_v16  ;;  %v2756_v60 = vsub.f32 %v6821_v9, %v2674_v30 }
 0x2f4   :  { %2724 = vmax.xlane.f32.xlu0 %v2723_v45  ;;  %v2671_v33 = vpop.xlane.xlu0 %2670 }
 0x2f8   :  { %v2677_v51 = vpop.xlane.xlu0 %2676 }
 0x2f9   :  { %v2757_v16 = vsub.f32 %v6829_v12, %v2677_v51 }
 0x2fb   :  { %v2796_v30 = vmul.f32 1.442695, %v2757_v16 }
 0x314   :  { %v6965_v18 = vpop.f32.mrb[26].mxu1 }
 0x315   :  { %v5787_v26 = vpop.f32.mrb[27].mxu1  ;;  %v2726_v27 = vsel %vm223_vm2, %v6965_v18, -inf }
 0x316   :  { %2727 = vmax.xlane.f32.xlu1 %v2726_v27 }
 0x318   :  { %v6971_v35 = vpop.f32.mrb[30].mxu0 }
 0x319   :  { %v5792_v45 = vpop.f32.mrb[31].mxu0  ;;  %v2729_v22 = vsel %vm223_vm2, %v6971_v35, -inf }
 0x31a   :  { %2730 = vmax.xlane.f32.xlu0 %v2729_v22  ;;  %v2786_v45 = vmul.f32 1.442695, %v2752_v41  ;;  %v2754_v22 = vsub.f32 %v6801_v57, %v2668_v43 }
 0x31c   :  { %v6975_v8 = vpop.f32.mrb[28].mxu1  ;;  %6139 = vpow2.f32 %v2786_v45 }
 0x31d   :  { %v5797_v26 = vpop.f32.mrb[29].mxu1  ;;  %v2732_v27 = vsel %vm223_vm2, %v6975_v8, -inf  ;;  %6141 = vpow2.f32 %v2788_v39 }
 0x31e   :  { %2733 = vmax.xlane.f32.xlu1 %v2732_v27  ;;  %v2755_v26 = vsub.f32 %v6809_v0, %v2671_v33  ;;  %v2790_v27 = vmul.f32 1.442695, %v2754_v22  ;;  %v2794_v0 = vmul.f32 1.442695, %v2756_v60 }
 0x320   :  { %v6981_v20 = vpop.f32.mrb[32].mxu0  ;;  %v2792_v43 = vmul.f32 1.442695, %v2755_v26  ;;  %6143 = vpow2.f32 %v2790_v27 }
 0x321   :  { %v5802_v14 = vpop.f32.mrb[33].mxu0  ;;  %v2735_v47 = vsel %vm223_vm2, %v6981_v20, -inf }
 0x322   :  { %2736 = vmax.xlane.f32.xlu0 %v2735_v47  ;;  %v6992_v14 = vpop.eup %6135  ;;  %6145 = vpow2.f32 %v2792_v43 }
 0x323   :  { %v6999_v22 = vpop.eup %6137  ;;  %v2846_v33 = vsel %vm223_vm2, %v6992_v14, 0.0  ;;  %6147 = vpow2.f32 %v2794_v0 }
 0x324   :  { %v2849_v27 = vsel %vm223_vm2, %v6999_v22, 0.0  ;;  %6149 = vpow2.f32 %v2796_v30 }
 0x325   :  { %v6988_v17 = vpop.f32.mrb[30].mxu1 }
 0x326   :  { %v5807_v41 = vpop.f32.mrb[31].mxu1  ;;  %v2738_v57 = vsel %vm223_vm2, %v6988_v17, -inf }
 0x327   :  { %2739 = vmax.xlane.f32.xlu1 %v2738_v57  ;;  %v7010_v41 = vpop.eup %6139 }
 0x328   :  { %v6995_v47 = vpop.f32.mrb[34].mxu0 }
 0x329   :  { %v5812_v45 = vpop.f32.mrb[35].mxu0  ;;  %v2741_v9 = vsel %vm223_vm2, %v6995_v47, -inf }
 0x32a   :  { %2742 = vmax.xlane.f32.xlu0 %v2741_v9  ;;  %v7017_v9 = vpop.eup %6141 }
 0x32b   :  { %2847 = vadd.xlane.f32.xlu1 %v2846_v33  ;;  %v2852_v33 = vsel %vm223_vm2, %v7010_v41, 0.0 }
 0x32c   :  { %v2680_v39 = vpop.xlane.xlu1 %2679 }
 0x32d   :  { %v7003_v12 = vpop.f32.mrb[32].mxu1  ;;  %v2758_v26 = vsub.f32 %v6853_v21, %v2680_v39  ;;  %v7021_v39 = vpop.eup %6143 }
 0x32e   :  { %v5817_v60 = vpop.f32.mrb[33].mxu1  ;;  %v2744_v51 = vsel %vm223_vm2, %v7003_v12, -inf  ;;  %2850 = vadd.xlane.f32.xlu0 %v2849_v27 }
 0x32f   :  { %v2798_v57 = vmul.f32 1.442695, %v2758_v26  ;;  %2745 = vmax.xlane.f32.xlu1 %v2744_v51  ;;  %v7026_v60 = vpop.eup %6145  ;;  %v2858_v51 = vsel %vm223_vm2, %v7021_v39, 0.0 }
 0x330   :  { %v7012_v43 = vpop.f32.mrb[36].mxu0  ;;  %v2683_v16 = vpop.xlane.xlu0 %2682 }
 0x331   :  { %6151 = vpow2.f32 %v2798_v57  ;;  %v2759_v0 = vsub.f32 %v6857_v25, %v2683_v16  ;;  %v5822_v21 = vpop.f32.mrb[37].mxu0  ;;  %v2747_v45 = vsel %vm223_vm2, %v7012_v43, -inf  ;;  %v2855_v25 = vsel %vm223_vm2, %v7017_v9, 0.0  ;;  %v7030_v57 = vpop.eup %6147 }
 0x332   :  { %2748 = vmax.xlane.f32.xlu0 %v2747_v45  ;;  %v7035_v45 = vpop.eup %6149 }
 0x333   :  { %v2800_v26 = vmul.f32 1.442695, %v2759_v0  ;;  %2853 = vadd.xlane.f32.xlu1 %v2852_v33  ;;  %v2864_v33 = vsel %vm223_vm2, %v7030_v57, 0.0 }
 0x334   :  { %v2686_v30 = vpop.xlane.xlu1 %2685 }
 0x335   :  { %6153 = vpow2.f32 %v2800_v26  ;;  %v2760_v27 = vsub.f32 %v6861_v28, %v2686_v30  ;;  %v2861_v28 = vsel %vm223_vm2, %v7026_v60, 0.0 }
 0x336   :  { %2856 = vadd.xlane.f32.xlu0 %v2855_v25 }
 0x337   :  { %v2802_v16 = vmul.f32 1.442695, %v2760_v27  ;;  %2859 = vadd.xlane.f32.xlu1 %v2858_v51 }
 0x338   :  { %v2689_v21 = vpop.xlane.xlu0 %2688 }
 0x339   :  { %6155 = vpow2.f32 %v2802_v16  ;;  %v2761_v0 = vsub.f32 %v6865_v31, %v2689_v21  ;;  %v2867_v31 = vsel %vm223_vm2, %v7035_v45, 0.0 }
 0x33a   :  { %2862 = vadd.xlane.f32.xlu0 %v2861_v28 }
 0x33b   :  { %v7039_v26 = vpop.eup %6151  ;;  %v2804_v30 = vmul.f32 1.442695, %v2761_v0  ;;  %2865 = vadd.xlane.f32.xlu1 %v2864_v33  ;;  %v7057_v33 = vpop.permute.xlu1 %4248 }
 0x33c   :  { %v2870_v27 = vsel %vm223_vm2, %v7039_v26, 0.0  ;;  %7724 = vst [vmem:[#allocation12_spill] sm:$0xff] %v7057_v33 }
 0x33d   :  { %6157 = vpow2.f32 %v2804_v30  ;;  %v7059_v30 = vpop.permute.xlu0 %4199 }
 0x33e   :  { %2868 = vadd.xlane.f32.xlu0 %v2867_v31  ;;  %7725 = vst [vmem:[#allocation13_spill] sm:$0xff] %v7059_v30 }
 0x33f   :  { %v7045_v25 = vpop.eup %6153  ;;  %2871 = vadd.xlane.f32.xlu1 %v2870_v27 }
 0x340   :  { %v2873_v51 = vsel %vm223_vm2, %v7045_v25, 0.0 }
 0x342   :  { %2874 = vadd.xlane.f32.xlu0 %v2873_v51 }
 0x343   :  { %v7049_v16 = vpop.eup %6155 }
 0x344   :  { %v2876_v21 = vsel %vm223_vm2, %v7049_v16, 0.0 }
 0x345   :  { %2877 = vadd.xlane.f32.xlu1 %v2876_v21 }
 0x347   :  { %v7053_v0 = vpop.eup %6157 }
 0x348   :  { %v2879_v28 = vsel %vm223_vm2, %v7053_v0, 0.0 }
 0x349   :  { %2880 = vadd.xlane.f32.xlu0 %v2879_v28 }
 0x369   :  { %v2692_v27 = vpop.xlane.xlu1 %2691 }
 0x36a   :  { %v2762_v31 = vsub.f32 %v6869_v34, %v2692_v27 }
 0x36c   :  { %v2806_v51 = vmul.f32 1.442695, %v2762_v31 }
 0x36d   :  { %v2695_v52 = vpop.xlane.xlu0 %2694  ;;  %v2698_v58 = vpop.xlane.xlu1 %2697 }
 0x36e   :  { %6159 = vpow2.f32 %v2806_v51  ;;  %v2763_v36 = vsub.f32 %v6871_v38, %v2695_v52  ;;  %v2764_v21 = vsub.f32 %v6873_v37, %v2698_v58 }
 0x370   :  { %v2808_v48 = vmul.f32 1.442695, %v2763_v36  ;;  %v2810_v56 = vmul.f32 1.442695, %v2764_v21 }
 0x371   :  { %v2701_v42 = vpop.xlane.xlu0 %2700  ;;  %v2704_v4 = vpop.xlane.xlu1 %2703 }
 0x372   :  { %6161 = vpow2.f32 %v2808_v48  ;;  %v2765_v28 = vsub.f32 %v6878_v44, %v2701_v42  ;;  %v2766_v33 = vsub.f32 %v6880_v46, %v2704_v4 }
 0x373   :  { %6163 = vpow2.f32 %v2810_v56 }
 0x374   :  { %v2812_v30 = vmul.f32 1.442695, %v2765_v28  ;;  %v2814_v34 = vmul.f32 1.442695, %v2766_v33 }
 0x375   :  { %v2707_v27 = vpop.xlane.xlu0 %2706  ;;  %v2710_v31 = vpop.xlane.xlu1 %2709 }
 0x376   :  { %6165 = vpow2.f32 %v2812_v30  ;;  %v2767_v51 = vsub.f32 %v6884_v49, %v2707_v27  ;;  %v2768_v38 = vsub.f32 %v6887_v50, %v2710_v31 }
 0x377   :  { %6167 = vpow2.f32 %v2814_v34 }
 0x378   :  { %v7068_v37 = vpop.eup %6159  ;;  %v2816_v36 = vmul.f32 1.442695, %v2767_v51  ;;  %v2818_v52 = vmul.f32 1.442695, %v2768_v38 }
 0x379   :  { %v2713_v48 = vpop.xlane.xlu0 %2712  ;;  %v2716_v58 = vpop.xlane.xlu1 %2715  ;;  %v2882_v44 = vsel %vm223_vm2, %v7068_v37, 0.0 }
 0x37a   :  { %6169 = vpow2.f32 %v2816_v36  ;;  %v2769_v46 = vsub.f32 %v6889_v53, %v2713_v48  ;;  %v2770_v42 = vsub.f32 %v6891_v54, %v2716_v58  ;;  %2883 = vadd.xlane.f32.xlu1 %v2882_v44 }
 0x37b   :  { %6171 = vpow2.f32 %v2818_v52 }
 0x37c   :  { %v7074_v49 = vpop.eup %6161  ;;  %v2820_v50 = vmul.f32 1.442695, %v2769_v46  ;;  %v2822_v56 = vmul.f32 1.442695, %v2770_v42 }
 0x37d   :  { %v7076_v4 = vpop.eup %6163  ;;  %v2719_v33 = vpop.xlane.xlu0 %2718  ;;  %v2885_v21 = vsel %vm223_vm2, %v7074_v49, 0.0 }
 0x37e   :  { %v2722_v30 = vpop.xlane.xlu1 %2721  ;;  %6173 = vpow2.f32 %v2820_v50  ;;  %v2771_v28 = vsub.f32 %v6893_v61, %v2719_v33  ;;  %2886 = vadd.xlane.f32.xlu0 %v2885_v21  ;;  %v2888_v54 = vsel %vm223_vm2, %v7076_v4, 0.0 }
 0x37f   :  { %v2772_v53 = vsub.f32 %v6895_v1, %v2722_v30  ;;  %6175 = vpow2.f32 %v2822_v56  ;;  %2889 = vadd.xlane.f32.xlu1 %v2888_v54 }
 0x380   :  { %v7084_v34 = vpop.eup %6165  ;;  %v2824_v27 = vmul.f32 1.442695, %v2771_v28 }
 0x381   :  { %v2826_v31 = vmul.f32 1.442695, %v2772_v53  ;;  %v7086_v51 = vpop.eup %6167  ;;  %v2725_v38 = vpop.xlane.xlu0 %2724  ;;  %v2891_v36 = vsel %vm223_vm2, %v7084_v34, 0.0 }
 0x382   :  { %6177 = vpow2.f32 %v2824_v27  ;;  %v2773_v61 = vsub.f32 %v6897_v5, %v2725_v38  ;;  %2892 = vadd.xlane.f32.xlu0 %v2891_v36  ;;  %v2894_v1 = vsel %vm223_vm2, %v7086_v51, 0.0  ;;  %v3064_v27 = vpack.c.bf16 %v6596_v62, %v6596_v62 }
 0x383   :  { %6179 = vpow2.f32 %v2826_v31  ;;  %2895 = vadd.xlane.f32.xlu1 %v2894_v1  ;;  %v3063_v31 = vpack.c.bf16 %v6584_v59, %v6584_v59 }
 0x384   :  { %v7093_v52 = vpop.eup %6169  ;;  %v2828_v48 = vmul.f32 1.442695, %v2773_v61 }
 0x385   :  { %v7095_v58 = vpop.eup %6171  ;;  %v2897_v44 = vsel %vm223_vm2, %v7093_v52, 0.0 }
 0x386   :  { %6181 = vpow2.f32 %v2828_v48  ;;  %2898 = vadd.xlane.f32.xlu0 %v2897_v44  ;;  %v2900_v46 = vsel %vm223_vm2, %v7095_v58, 0.0 }
 0x387   :  { %2901 = vadd.xlane.f32.xlu1 %v2900_v46 }
 0x388   :  { %v7101_v5 = vpop.eup %6173 }
 0x389   :  { %v7103_v42 = vpop.eup %6175  ;;  %v2903_v50 = vsel %vm223_vm2, %v7101_v5, 0.0 }
 0x38a   :  { %2904 = vadd.xlane.f32.xlu0 %v2903_v50  ;;  %v2906_v56 = vsel %vm223_vm2, %v7103_v42, 0.0 }
 0x38b   :  { %2907 = vadd.xlane.f32.xlu1 %v2906_v56 }
 0x38c   :  { %v7109_v33 = vpop.eup %6177 }
 0x38d   :  { %v7111_v30 = vpop.eup %6179  ;;  %v2909_v21 = vsel %vm223_vm2, %v7109_v33, 0.0 }
 0x38e   :  { %2910 = vadd.xlane.f32.xlu0 %v2909_v21  ;;  %v2912_v28 = vsel %vm223_vm2, %v7111_v30, 0.0 }
 0x38f   :  { %2913 = vadd.xlane.f32.xlu1 %v2912_v28 }
 0x390   :  { %v7117_v53 = vpop.eup %6181 }
 0x391   :  { %v2915_v54 = vsel %vm223_vm2, %v7117_v53, 0.0 }
 0x392   :  { %2916 = vadd.xlane.f32.xlu0 %v2915_v54 }
 0x3a0   :  { %4346 = vrot.lane.b32.xlu1 %v3064_v27, %s6309_s25 }
 0x3a3   :  { %v2728_v38 = vpop.xlane.xlu1 %2727 }
 0x3a4   :  { %v2774_v61 = vsub.f32 %v6965_v18, %v2728_v38 }
 0x3a6   :  { %v2830_v50 = vmul.f32 1.442695, %v2774_v61 }
 0x3a7   :  { %v2731_v36 = vpop.xlane.xlu0 %2730 }
 0x3a8   :  { %4297 = vrot.lane.b32.xlu0 %v3063_v31, %s6309_s25  ;;  %v2775_v48 = vsub.f32 %v6971_v35, %v2731_v36  ;;  %6183 = vpow2.f32 %v2830_v50 }
 0x3aa   :  { %v2832_v56 = vmul.f32 1.442695, %v2775_v48 }
 0x3ab   :  { %v2734_v1 = vpop.xlane.xlu1 %2733 }
 0x3ac   :  { %v2776_v44 = vsub.f32 %v6975_v8, %v2734_v1  ;;  %6185 = vpow2.f32 %v2832_v56 }
 0x3ae   :  { %v2834_v28 = vmul.f32 1.442695, %v2776_v44 }
 0x3af   :  { %v2737_v46 = vpop.xlane.xlu0 %2736 }
 0x3b0   :  { %v2777_v62 = vsub.f32 %v6981_v20, %v2737_v46  ;;  %6187 = vpow2.f32 %v2834_v28 }
 0x3b2   :  { %v2836_v27 = vmul.f32 1.442695, %v2777_v62 }
 0x3b4   :  { %v2740_v21 = vpop.xlane.xlu1 %2739 }
 0x3b5   :  { %v2778_v59 = vsub.f32 %v6988_v17, %v2740_v21  ;;  %v7134_v17 = vpop.eup %6183 }
 0x3b6   :  { %v7137_v44 = vpop.eup %6185 }
 0x3b7   :  { %v2743_v54 = vpop.xlane.xlu0 %2742  ;;  %v2838_v35 = vmul.f32 1.442695, %v2778_v59  ;;  %v2921_v59 = vsel %vm223_vm2, %v7137_v44, 0.0 }
 0x3b8   :  { %v2779_v18 = vsub.f32 %v6995_v47, %v2743_v54  ;;  %v2848_v31 = vpop.xlane.xlu1 %2847 }
 0x3b9   :  { %6189 = vrcp.f32 %v2848_v31 }
 0x3ba   :  { %6191 = vpow2.f32 %v2836_v27  ;;  %v2840_v38 = vmul.f32 1.442695, %v2779_v18  ;;  %v7139_v50 = vpop.eup %6187 }
 0x3bb   :  { %v2851_v8 = vpop.xlane.xlu0 %2850  ;;  %v2924_v18 = vsel %vm223_vm2, %v7139_v50, 0.0 }
 0x3bc   :  { %v2746_v36 = vpop.xlane.xlu1 %2745  ;;  %6193 = vrcp.f32 %v2851_v8 }
 0x3bd   :  { %v2780_v20 = vsub.f32 %v7003_v12, %v2746_v36  ;;  %6195 = vpow2.f32 %v2838_v35  ;;  %v2918_v12 = vsel %vm223_vm2, %v7134_v17, 0.0 }
 0x3be   :  { %6197 = vpow2.f32 %v2840_v38 }
 0x3bf   :  { %v2842_v61 = vmul.f32 1.442695, %v2780_v20  ;;  %v2749_v1 = vpop.xlane.xlu0 %2748 }
 0x3c0   :  { %v2781_v48 = vsub.f32 %v7012_v43, %v2749_v1  ;;  %v2854_v47 = vpop.xlane.xlu1 %2853 }
 0x3c1   :  { %6199 = vpow2.f32 %v2842_v61  ;;  %v7726_v61 = vmov 0.0  }
 0x3c2   :  { %v2844_v46 = vmul.f32 1.442695, %v2781_v48  ;;  %6201 = vrcp.f32 %v2854_v47  ;;  %v3225_v47 = vsel %vm3076_vm3, %v6901_v11, 0 }
 0x3c3   :  { %v2857_v56 = vpop.xlane.xlu0 %2856  ;;  %v6190_v62 = vpop.eup %6189 }
 0x3c4   :  { %6203 = vpow2.f32 %v2844_v46  ;;  %2919 = vadd.xlane.f32.xlu1 %v2918_v12  ;;  %v2860_v21 = vpop.xlane.xlu1 %2859  ;;  %v2943_v28 = vmul.f32 %v6190_v62, %v6992_v14  ;;  %v7144_v43 = vpop.eup %6191  ;;  %v3176_v14 = vsel %vm3076_vm3, %v6899_v10, 0 }
 0x3c5   :  { %6205 = vrcp.f32 %v2857_v56  ;;  %v2927_v36 = vsel %vm223_vm2, %v7144_v43, 0.0 }
 0x3c6   :  { %6207 = vrcp.f32 %v2860_v21  ;;  %v6194_v54 = vpop.eup %6193  ;;  %v3006_v31 = vpack.c.bf16 %v2943_v28, %v2943_v28 }
 0x3c7   :  { %2922 = vadd.xlane.f32.xlu0 %v2921_v59  ;;  %v2863_v27 = vpop.xlane.xlu0 %2862  ;;  %v7150_v35 = vpop.eup %6195  ;;  %v2945_v8 = vmul.f32 %v6194_v54, %v6999_v22  ;;  %v3274_v54 = vsel %vm3076_vm3, %v6903_v13, 0  ;;  %v3323_v13 = vsel %vm3076_vm3, %v6907_v15, 0 }
 0x3c8   :  { %2925 = vadd.xlane.f32.xlu1 %v2924_v18  ;;  %6209 = vrcp.f32 %v2863_v27  ;;  %5826 = vmatmul.mubr.msk.bf16.vlgmr.msra.gmra.mrb[36].mxu1 %vm223_vm2, %v3006_v31  ;;  %v7156_v38 = vpop.eup %6197  ;;  %v2866_v22 = vpop.xlane.xlu1 %2865  ;;  %v2930_v10 = vsel %vm223_vm2, %v7150_v35, 0.0 }
 0x3c9   :  { %5836 = vmatpush3.bf16.msra.mxu1 %v3176_v14  ;;  %v3007_v20 = vpack.c.bf16 %v2945_v8, %v2945_v8  ;;  %5837 = vmatprep.mubr.msk.bf16.mxu1 %vm6305_vm1, %v7726_v61  ;;  %6211 = vrcp.f32 %v2866_v22  ;;  %v2933_v62 = vsel %vm223_vm2, %v7156_v38, 0.0  ;;  %v3372_v22 = vsel %vm3076_vm3, %v6913_v19, 0 }
 0x3ca   :  { %5847 = vmatprep.subr.bf16.mxu1 %v7726_v61 }
 0x3cb   :  { %v7162_v1 = vpop.eup %6199  ;;  %2928 = vadd.xlane.f32.xlu0 %v2927_v36  ;;  %5832 = vmatmul.mubr.msk.bf16.vlgmr.msra.gmra.mrb[40].mxu0 %vm223_vm2, %v3007_v20  ;;  %v2869_v12 = vpop.xlane.xlu0 %2868 }
 0x3cc   :  { %v6202_v48 = vpop.eup %6201  ;;  %2931 = vadd.xlane.f32.xlu1 %v2930_v10  ;;  %5842 = vmatpush3.bf16.msra.mxu0 %v3225_v47  ;;  %v2936_v11 = vsel %vm223_vm2, %v7162_v1, 0.0  ;;  %6213 = vrcp.f32 %v2869_v12  ;;  %v2872_v14 = vpop.xlane.xlu1 %2871  ;;  %v3421_v47 = vsel %vm3076_vm3, %v6919_v23, 0  ;;  %v3470_v23 = vsel %vm3076_vm3, %v6921_v24, 0 }
 0x3cd   :  { %v2947_v46 = vmul.f32 %v6202_v48, %v7010_v41  ;;  %5843 = vmatprep.mubr.msk.bf16.mxu0 %vm6305_vm1, %v7726_v61  ;;  %5853 = vmatprep.subr.bf16.mxu0 %v7726_v61  ;;  %6215 = vrcp.f32 %v2872_v14  ;;  %v3519_v24 = vsel %vm3076_vm3, %v6927_v29, 0  ;;  %v3066_v29 = vpack.c.bf16 %v6616_v2, %v6616_v2 }
 0x3ce   :  { %v7173_v56 = vpop.eup %6203  ;;  %v3068_v2 = vpack.c.bf16 %v6636_v6, %v6636_v6 }
 0x3cf   :  { %v6206_v21 = vpop.eup %6205  ;;  %2934 = vadd.xlane.f32.xlu0 %v2933_v62  ;;  %v3008_v28 = vpack.c.bf16 %v2947_v46, %v2947_v46  ;;  %v2939_v27 = vsel %vm223_vm2, %v7173_v56, 0.0  ;;  %v2875_v36 = vpop.xlane.xlu0 %2874 }
 0x3d0   :  { %v6208_v41 = vpop.eup %6207  ;;  %v2949_v59 = vmul.f32 %v6206_v21, %v7017_v9  ;;  %2937 = vadd.xlane.f32.xlu1 %v2936_v11  ;;  %6217 = vrcp.f32 %v2875_v36  ;;  %v3067_v11 = vpack.c.bf16 %v6624_v3, %v6624_v3  ;;  %v3069_v3 = vpack.c.bf16 %v6644_v7, %v6644_v7 }
 0x3d1   :  { %5838 = vmatmul.mubr.msk.bf16.vlgmr.msra.gmra.mrb[40].mxu1 %vm223_vm2, %v3008_v28  ;;  %v2951_v8 = vmul.f32 %v6208_v41, %v7021_v39  ;;  %v3617_v7 = vsel %vm3076_vm3, %v6939_v40, 0  ;;  %v7727_v40 = vld [vmem:[#allocation9_spill] sm:$0xff] }
 0x3d2   :  { %5848 = vmatpush3.bf16.msra.mxu1 %v3274_v54  ;;  %v3009_v18 = vpack.c.bf16 %v2949_v59, %v2949_v59  ;;  %5849 = vmatprep.mubr.msk.bf16.mxu1 %vm6305_vm1, %v7726_v61  ;;  %v6210_v31 = vpop.eup %6209  ;;  %v2878_v48 = vpop.xlane.xlu1 %2877  ;;  %v3568_v59 = vsel %vm3076_vm3, %v6933_v32, 0 }
 0x3d3   :  { %2940 = vadd.xlane.f32.xlu0 %v2939_v27  ;;  %5859 = vmatprep.subr.bf16.mxu1 %v7726_v61  ;;  %v2953_v9 = vmul.f32 %v6210_v31, %v7026_v60  ;;  %v3010_v39 = vpack.c.bf16 %v2951_v8, %v2951_v8  ;;  %v6212_v20 = vpop.eup %6211  ;;  %6219 = vrcp.f32 %v2878_v48 }
 0x3d4   :  { %5844 = vmatmul.mubr.msk.bf16.vlgmr.msra.gmra.mrb[44].mxu0 %vm223_vm2, %v3009_v18  ;;  %v2955_v60 = vmul.f32 %v6212_v20, %v7030_v57  ;;  %v3065_v57 = vpack.c.bf16 %v6604_v63, %v6604_v63  ;;  %v3666_v18 = vsel %vm3076_vm3, %v6959_v55, 0 }
 0x3d5   :  { %5854 = vmatpush3.bf16.msra.mxu0 %v3323_v13  ;;  %5855 = vmatprep.mubr.msk.bf16.mxu0 %vm6305_vm1, %v7726_v61  ;;  %v3011_v15 = vpack.c.bf16 %v2953_v9, %v2953_v9 }
 0x3d6   :  { %5865 = vmatprep.subr.bf16.mxu0 %v7726_v61  ;;  %v6214_v10 = vpop.eup %6213  ;;  %v2881_v46 = vpop.xlane.xlu0 %2880  ;;  %v3012_v12 = vpack.c.bf16 %v2955_v60, %v2955_v60 }
 0x3d7   :  { %v2957_v19 = vmul.f32 %v6214_v10, %v7035_v45  ;;  %v6216_v62 = vpop.eup %6215  ;;  %6221 = vrcp.f32 %v2881_v46  ;;  %v7728_v10 = vld [vmem:[#allocation2_spill] sm:$0xff] }
 0x3d8   :  { %v2959_v63 = vmul.f32 %v6216_v62, %v7039_v26  ;;  %v3764_v60 = vsel %vm3076_vm3, %v7728_v10, 0 }
 0x3d9   :  { %5850 = vmatmul.mubr.msk.bf16.vlgmr.msra.gmra.mrb[44].mxu1 %vm223_vm2, %v3010_v39  ;;  %v3013_v21 = vpack.c.bf16 %v2957_v19, %v2957_v19 }
 0x3da   :  { %5860 = vmatpush3.bf16.msra.mxu1 %v3372_v22  ;;  %5861 = vmatprep.mubr.msk.bf16.mxu1 %vm6305_vm1, %v7726_v61  ;;  %v6218_v45 = vpop.eup %6217  ;;  %v3014_v26 = vpack.c.bf16 %v2959_v63, %v2959_v63 }
 0x3db   :  { %5871 = vmatprep.subr.bf16.mxu1 %v7726_v61  ;;  %v2961_v28 = vmul.f32 %v6218_v45, %v7045_v25 }
 0x3dc   :  { %5856 = vmatmul.mubr.msk.bf16.vlgmr.msra.gmra.mrb[48].mxu0 %vm223_vm2, %v3011_v15 }
 0x3dd   :  { %5866 = vmatpush3.bf16.msra.mxu0 %v3421_v47  ;;  %5867 = vmatprep.mubr.msk.bf16.mxu0 %vm6305_vm1, %v7726_v61  ;;  %v6220_v41 = vpop.eup %6219  ;;  %v3015_v25 = vpack.c.bf16 %v2961_v28, %v2961_v28  ;;  %v7731_v28 = vld [vmem:[#allocation3_spill] sm:$0xff] }
 0x3de   :  { %5877 = vmatprep.subr.bf16.mxu0 %v7726_v61  ;;  %v2963_v27 = vmul.f32 %v6220_v41, %v7049_v16 }
 0x3e0   :  { %v3016_v16 = vpack.c.bf16 %v2963_v27, %v2963_v27 }
 0x3e1   :  { %5862 = vmatmul.mubr.msk.bf16.vlgmr.msra.gmra.mrb[48].mxu1 %vm223_vm2, %v3012_v12  ;;  %4395 = vrot.lane.b32.xlu1 %v3065_v57, %s6309_s25  ;;  %v6222_v54 = vpop.eup %6221  ;;  %v7729_v57 = vld [vmem:[#allocation7_spill] sm:$0xff] }
 0x3e2   :  { %5872 = vmatpush3.bf16.msra.mxu1 %v3470_v23  ;;  %5873 = vmatprep.mubr.msk.bf16.mxu1 %vm6305_vm1, %v7726_v61  ;;  %v2965_v32 = vmul.f32 %v6222_v54, %v7053_v0  ;;  %v3715_v0 = vsel %vm3076_vm3, %v7727_v40, 0  ;;  %v3813_v12 = vsel %vm3076_vm3, %v7729_v57, 0  ;;  %v7734_v40 = vld [vmem:[#allocation11_spill] sm:$0xff] }
 0x3e3   :  { %5883 = vmatprep.subr.bf16.mxu1 %v7726_v61 }
 0x3e4   :  { %5868 = vmatmul.mubr.msk.bf16.vlgmr.msra.gmra.mrb[52].mxu0 %vm223_vm2, %v3013_v21  ;;  %v3017_v6 = vpack.c.bf16 %v2965_v32, %v2965_v32  ;;  %v7730_v21 = vld [vmem:[#allocation4_spill] sm:$0xff] }
 0x3e5   :  { %5878 = vmatpush3.bf16.msra.mxu0 %v3519_v24  ;;  %4493 = vrot.lane.b32.xlu1 %v3067_v11, %s6309_s25  ;;  %v3862_v45 = vsel %vm3076_vm3, %v7730_v21, 0 }
 0x3e6   :  { %5879 = vmatprep.mubr.msk.bf16.mxu0 %vm6305_vm1, %v7726_v61  ;;  %5889 = vmatprep.subr.bf16.mxu0 %v7726_v61 }
 0x3e9   :  { %5874 = vmatmul.mubr.msk.bf16.vlgmr.msra.gmra.mrb[52].mxu1 %vm223_vm2, %v3014_v26  ;;  %4591 = vrot.lane.b32.xlu1 %v3069_v3, %s6309_s25  ;;  %v3911_v3 = vsel %vm3076_vm3, %v7731_v28, 0 }
 0x3ea   :  { %5884 = vmatpush3.bf16.msra.mxu1 %v3568_v59  ;;  %4444 = vrot.lane.b32.xlu0 %v3066_v29, %s6309_s25  ;;  %v7732_v59 = vld [vmem:[#allocation6_spill] sm:$0xff] }
 0x3eb   :  { %5885 = vmatprep.mubr.msk.bf16.mxu1 %vm6305_vm1, %v7726_v61  ;;  %5895 = vmatprep.subr.bf16.mxu1 %v7726_v61 }
 0x3ec   :  { %5880 = vmatmul.mubr.msk.bf16.vlgmr.msra.gmra.mrb[56].mxu0 %vm223_vm2, %v3015_v25  ;;  %v3960_v25 = vsel %vm3076_vm3, %v7732_v59, 0 }
 0x3ed   :  { %5890 = vmatpush3.bf16.msra.mxu0 %v3617_v7  ;;  %5891 = vmatprep.mubr.msk.bf16.mxu0 %vm6305_vm1, %v7726_v61  ;;  %v7733_v7 = vld [vmem:[#allocation5_spill] sm:$0xff] }
 0x3ee   :  { %4542 = vrot.lane.b32.xlu0 %v3068_v2, %s6309_s25  ;;  %5901 = vmatprep.subr.bf16.mxu0 %v7726_v61  ;;  %v4009_v32 = vsel %vm3076_vm3, %v7733_v7, 0 }
 0x3f1   :  { %5886 = vmatmul.mubr.msk.bf16.vlgmr.msra.gmra.mrb[56].mxu1 %vm223_vm2, %v3016_v16 }
 0x3f2   :  { %5896 = vmatpush3.bf16.msra.mxu1 %v3666_v18  ;;  %5897 = vmatprep.mubr.msk.bf16.mxu1 %vm6305_vm1, %v7726_v61 }
 0x3f3   :  { %5907 = vmatprep.subr.bf16.mxu1 %v7726_v61 }
 0x3f4   :  { %5892 = vmatmul.mubr.msk.bf16.vlgmr.msra.gmra.mrb[60].mxu0 %vm223_vm2, %v3017_v6 }
 0x3f5   :  { %5902 = vmatpush3.bf16.msra.mxu0 %v3715_v0  ;;  %5903 = vmatprep.mubr.msk.bf16.mxu0 %vm6305_vm1, %v7726_v61  ;;  %v4058_v0 = vsel %vm3076_vm3, %v7734_v40, 0 }
 0x3f6   :  { %5913 = vmatprep.subr.bf16.mxu0 %v7726_v61 }
 0x407   :  { %v2884_v55 = vpop.xlane.xlu1 %2883 }
 0x408   :  { %6223 = vrcp.f32 %v2884_v55 }
 0x40b   :  { %v2887_v31 = vpop.xlane.xlu0 %2886 }
 0x40c   :  { %6225 = vrcp.f32 %v2887_v31  ;;  %v2890_v8 = vpop.xlane.xlu1 %2889 }
 0x40d   :  { %6227 = vrcp.f32 %v2890_v8  ;;  %v7735_v8 = vld [vmem:[#allocation10_spill] sm:$0xff] }
 0x40f   :  { %v2893_v14 = vpop.xlane.xlu0 %2892 }
 0x410   :  { %6229 = vrcp.f32 %v2893_v14  ;;  %v2896_v13 = vpop.xlane.xlu1 %2895  ;;  %v4107_v14 = vsel %vm3076_vm3, %v7735_v8, 0 }
 0x411   :  { %6231 = vrcp.f32 %v2896_v13 }
 0x412   :  { %v6224_v9 = vpop.eup %6223 }
 0x413   :  { %v2967_v36 = vmul.f32 %v6224_v9, %v7068_v37  ;;  %v2899_v39 = vpop.xlane.xlu0 %2898 }
 0x414   :  { %6233 = vrcp.f32 %v2899_v39  ;;  %v2902_v37 = vpop.xlane.xlu1 %2901 }
 0x415   :  { %v3018_v20 = vpack.c.bf16 %v2967_v36, %v2967_v36  ;;  %6235 = vrcp.f32 %v2902_v37 }
 0x416   :  { %v6226_v22 = vpop.eup %6225 }
 0x417   :  { %v6228_v15 = vpop.eup %6227  ;;  %v2969_v48 = vmul.f32 %v6226_v22, %v7074_v49  ;;  %5898 = vmatmul.mubr.msk.bf16.vlgmr.msra.gmra.mrb[60].mxu1 %vm223_vm2, %v3018_v20  ;;  %v2905_v62 = vpop.xlane.xlu0 %2904 }
 0x418   :  { %5908 = vmatpush3.bf16.msra.mxu1 %v3764_v60  ;;  %5909 = vmatprep.mubr.msk.bf16.mxu1 %vm6305_vm1, %v7726_v61  ;;  %v2971_v47 = vmul.f32 %v6228_v15, %v7076_v4  ;;  %6237 = vrcp.f32 %v2905_v62  ;;  %v2908_v63 = vpop.xlane.xlu1 %2907 }
 0x419   :  { %v3019_v19 = vpack.c.bf16 %v2969_v48, %v2969_v48  ;;  %5919 = vmatprep.subr.bf16.mxu1 %v7726_v61  ;;  %6239 = vrcp.f32 %v2908_v63 }
 0x41a   :  { %v6230_v46 = vpop.eup %6229  ;;  %v3020_v23 = vpack.c.bf16 %v2971_v47, %v2971_v47  ;;  %v7738_v47 = vld [vmem:[#allocation12_spill] sm:$0xff] }
 0x41b   :  { %5904 = vmatmul.mubr.msk.bf16.vlgmr.msra.gmra.mrb[64].mxu0 %vm223_vm2, %v3019_v19  ;;  %v2973_v49 = vmul.f32 %v6230_v46, %v7084_v34  ;;  %v6232_v4 = vpop.eup %6231  ;;  %v2911_v41 = vpop.xlane.xlu0 %2910 }
 0x41c   :  { %5914 = vmatpush3.bf16.msra.mxu0 %v3813_v12  ;;  %5915 = vmatprep.mubr.msk.bf16.mxu0 %vm6305_vm1, %v7726_v61  ;;  %v2975_v11 = vmul.f32 %v6232_v4, %v7086_v51  ;;  %6241 = vrcp.f32 %v2911_v41  ;;  %v2914_v27 = vpop.xlane.xlu1 %2913 }
 0x41d   :  { %5925 = vmatprep.subr.bf16.mxu0 %v7726_v61  ;;  %v3021_v24 = vpack.c.bf16 %v2973_v49, %v2973_v49  ;;  %6243 = vrcp.f32 %v2914_v27 }
 0x41e   :  { %v6234_v34 = vpop.eup %6233  ;;  %v3022_v29 = vpack.c.bf16 %v2975_v11, %v2975_v11 }
 0x41f   :  { %5910 = vmatmul.mubr.msk.bf16.vlgmr.msra.gmra.mrb[64].mxu1 %vm223_vm2, %v3020_v23  ;;  %v2977_v26 = vmul.f32 %v6234_v34, %v7093_v52  ;;  %v6236_v51 = vpop.eup %6235  ;;  %v2917_v18 = vpop.xlane.xlu0 %2916 }
 0x420   :  { %5920 = vmatpush3.bf16.msra.mxu1 %v3862_v45  ;;  %5921 = vmatprep.mubr.msk.bf16.mxu1 %vm6305_vm1, %v7726_v61  ;;  %v2979_v54 = vmul.f32 %v6236_v51, %v7095_v58  ;;  %6245 = vrcp.f32 %v2917_v18 }
 0x421   :  { %5931 = vmatprep.subr.bf16.mxu1 %v7726_v61  ;;  %v3023_v2 = vpack.c.bf16 %v2977_v26, %v2977_v26 }
 0x422   :  { %v6238_v52 = vpop.eup %6237  ;;  %v3024_v6 = vpack.c.bf16 %v2979_v54, %v2979_v54 }
 0x423   :  { %5916 = vmatmul.mubr.msk.bf16.vlgmr.msra.gmra.mrb[68].mxu0 %vm223_vm2, %v3021_v24  ;;  %v2981_v16 = vmul.f32 %v6238_v52, %v7101_v5  ;;  %v6240_v58 = vpop.eup %6239  ;;  %v4298_v37 = vpop.permute.xlu0 %4297 }
 0x424   :  { %5926 = vmatpush3.bf16.msra.mxu0 %v3911_v3  ;;  %5927 = vmatprep.mubr.msk.bf16.mxu0 %vm6305_vm1, %v7726_v61  ;;  %v2983_v55 = vmul.f32 %v6240_v58, %v7103_v42  ;;  %v7736_v42 = vld [vmem:[#allocation8_spill] sm:$0xff]  ;;  %v4303_v46 = vsel %vm3076_vm3, %v4298_v37, 0 }
 0x425   :  { %5937 = vmatprep.subr.bf16.mxu0 %v7726_v61  ;;  %v3025_v31 = vpack.c.bf16 %v2981_v16, %v2981_v16  ;;  %v4156_v39 = vsel %vm3076_vm3, %v7736_v42, 0 }
 0x426   :  { %v6242_v5 = vpop.eup %6241  ;;  %v3026_v9 = vpack.c.bf16 %v2983_v55, %v2983_v55 }
 0x427   :  { %5922 = vmatmul.mubr.msk.bf16.vlgmr.msra.gmra.mrb[68].mxu1 %vm223_vm2, %v3022_v29  ;;  %v2985_v13 = vmul.f32 %v6242_v5, %v7109_v33  ;;  %v6244_v36 = vpop.eup %6243  ;;  %v7737_v33 = vld [vmem:[#allocation13_spill] sm:$0xff] }
 0x428   :  { %5932 = vmatpush3.bf16.msra.mxu1 %v3960_v25  ;;  %5933 = vmatprep.mubr.msk.bf16.mxu1 %vm6305_vm1, %v7726_v61  ;;  %v2987_v20 = vmul.f32 %v6244_v36, %v7111_v30  ;;  %v4205_v10 = vsel %vm3076_vm3, %v7737_v33, 0  ;;  %v4254_v30 = vsel %vm3076_vm3, %v7738_v47, 0 }
 0x429   :  { %5943 = vmatprep.subr.bf16.mxu1 %v7726_v61  ;;  %v3027_v22 = vpack.c.bf16 %v2985_v13, %v2985_v13 }
 0x42a   :  { %v6246_v15 = vpop.eup %6245  ;;  %v3028_v48 = vpack.c.bf16 %v2987_v20, %v2987_v20 }
 0x42b   :  { %5928 = vmatmul.mubr.msk.bf16.vlgmr.msra.gmra.mrb[72].mxu0 %vm223_vm2, %v3023_v2  ;;  %v2989_v60 = vmul.f32 %v6246_v15, %v7117_v53  ;;  %v4347_v53 = vpop.permute.xlu1 %4346 }
 0x42c   :  { %5938 = vmatpush3.bf16.msra.mxu0 %v4009_v32  ;;  %5939 = vmatprep.mubr.msk.bf16.mxu0 %vm6305_vm1, %v7726_v61  ;;  %v4352_v26 = vsel %vm3076_vm3, %v4347_v53, 0 }
 0x42d   :  { %5949 = vmatprep.subr.bf16.mxu0 %v7726_v61  ;;  %v3029_v19 = vpack.c.bf16 %v2989_v60, %v2989_v60 }
 0x42f   :  { %5934 = vmatmul.mubr.msk.bf16.vlgmr.msra.gmra.mrb[72].mxu1 %vm223_vm2, %v3024_v6 }
 0x430   :  { %5944 = vmatpush3.bf16.msra.mxu1 %v4058_v0  ;;  %5945 = vmatprep.mubr.msk.bf16.mxu1 %vm6305_vm1, %v7726_v61 }
 0x431   :  { %5955 = vmatprep.subr.bf16.mxu1 %v7726_v61 }
 0x433   :  { %5940 = vmatmul.mubr.msk.bf16.vlgmr.msra.gmra.mrb[76].mxu0 %vm223_vm2, %v3025_v31 }
 0x434   :  { %5950 = vmatpush3.bf16.msra.mxu0 %v4107_v14  ;;  %5951 = vmatprep.mubr.msk.bf16.mxu0 %vm6305_vm1, %v7726_v61 }
 0x435   :  { %5961 = vmatprep.subr.bf16.mxu0 %v7726_v61 }
 0x437   :  { %5946 = vmatmul.mubr.msk.bf16.vlgmr.msra.gmra.mrb[76].mxu1 %vm223_vm2, %v3026_v9 }
 0x438   :  { %5956 = vmatpush3.bf16.msra.mxu1 %v4156_v39  ;;  %5957 = vmatprep.mubr.msk.bf16.mxu1 %vm6305_vm1, %v7726_v61 }
 0x439   :  { %5967 = vmatprep.subr.bf16.mxu1 %v7726_v61 }
 0x43b   :  { %5952 = vmatmul.mubr.msk.bf16.vlgmr.msra.gmra.mrb[80].mxu0 %vm223_vm2, %v3027_v22 }
 0x43c   :  { %5962 = vmatpush3.bf16.msra.mxu0 %v4205_v10  ;;  %5963 = vmatprep.mubr.msk.bf16.mxu0 %vm6305_vm1, %v7726_v61 }
 0x43d   :  { %5973 = vmatprep.subr.bf16.mxu0 %v7726_v61 }
 0x43f   :  { %5958 = vmatmul.mubr.msk.bf16.vlgmr.msra.gmra.mrb[80].mxu1 %vm223_vm2, %v3028_v48 }
 0x440   :  { %5968 = vmatpush3.bf16.msra.mxu1 %v4254_v30  ;;  %5969 = vmatprep.mubr.msk.bf16.mxu1 %vm6305_vm1, %v7726_v61 }
 0x441   :  { %5979 = vmatprep.subr.bf16.mxu1 %v7726_v61 }
 0x443   :  { %5964 = vmatmul.mubr.msk.bf16.vlgmr.msra.gmra.mrb[84].mxu0 %vm223_vm2, %v3029_v19 }
 0x444   :  { %5974 = vmatpush3.bf16.msra.mxu0 %v4303_v46  ;;  %5975 = vmatprep.mubr.msk.bf16.mxu0 %vm6305_vm1, %v7726_v61 }
 0x445   :  { %5985 = vmatprep.subr.bf16.mxu0 %v7726_v61 }
 0x451   :  { %v2920_v57 = vpop.xlane.xlu1 %2919 }
 0x452   :  { %6247 = vrcp.f32 %v2920_v57 }
 0x454   :  { %v2923_v12 = vpop.xlane.xlu0 %2922 }
 0x455   :  { %6249 = vrcp.f32 %v2923_v12  ;;  %v2926_v49 = vpop.xlane.xlu1 %2925 }
 0x456   :  { %6251 = vrcp.f32 %v2926_v49 }
 0x458   :  { %v2929_v62 = vpop.xlane.xlu0 %2928 }
 0x459   :  { %6253 = vrcp.f32 %v2929_v62  ;;  %v2932_v23 = vpop.xlane.xlu1 %2931 }
 0x45a   :  { %6255 = vrcp.f32 %v2932_v23 }
 0x45c   :  { %v6248_v4 = vpop.eup %6247  ;;  %v2935_v21 = vpop.xlane.xlu0 %2934 }
 0x45d   :  { %v2991_v45 = vmul.f32 %v6248_v4, %v7134_v17  ;;  %v2938_v11 = vpop.xlane.xlu1 %2937  ;;  %6257 = vrcp.f32 %v2935_v21 }
 0x45e   :  { %6259 = vrcp.f32 %v2938_v11 }
 0x45f   :  { %v6250_v63 = vpop.eup %6249  ;;  %v3030_v24 = vpack.c.bf16 %v2991_v45, %v2991_v45 }
 0x460   :  { %v6252_v34 = vpop.eup %6251  ;;  %v2993_v28 = vmul.f32 %v6250_v63, %v7137_v44  ;;  %v2941_v3 = vpop.xlane.xlu0 %2940 }
 0x461   :  { %5970 = vmatmul.mubr.msk.bf16.vlgmr.msra.gmra.mrb[84].mxu1 %vm223_vm2, %v3030_v24  ;;  %v4396_v41 = vpop.permute.xlu1 %4395  ;;  %v2995_v51 = vmul.f32 %v6252_v34, %v7139_v50  ;;  %6261 = vrcp.f32 %v2941_v3 }
 0x462   :  { %5980 = vmatpush3.bf16.msra.mxu1 %v4352_v26  ;;  %v3031_v29 = vpack.c.bf16 %v2993_v28, %v2993_v28  ;;  %5981 = vmatprep.mubr.msk.bf16.mxu1 %vm6305_vm1, %v7726_v61  ;;  %v4401_v59 = vsel %vm3076_vm3, %v4396_v41, 0 }
 0x463   :  { %v6254_v17 = vpop.eup %6253  ;;  %5991 = vmatprep.subr.bf16.mxu1 %v7726_v61  ;;  %v3032_v54 = vpack.c.bf16 %v2995_v51, %v2995_v51 }
 0x464   :  { %5976 = vmatmul.mubr.msk.bf16.vlgmr.msra.gmra.mrb[88].mxu0 %vm223_vm2, %v3031_v29  ;;  %v2997_v44 = vmul.f32 %v6254_v17, %v7144_v43  ;;  %v4445_v25 = vpop.permute.xlu0 %4444  ;;  %v6256_v27 = vpop.eup %6255 }
 0x465   :  { %5986 = vmatpush3.bf16.msra.mxu0 %v4401_v59  ;;  %5987 = vmatprep.mubr.msk.bf16.mxu0 %vm6305_vm1, %v7726_v61  ;;  %v4450_v50 = vsel %vm3076_vm3, %v4445_v25, 0  ;;  %v4494_v2 = vpop.permute.xlu1 %4493  ;;  %v2999_v43 = vmul.f32 %v6256_v27, %v7150_v35 }
 0x466   :  { %5997 = vmatprep.subr.bf16.mxu0 %v7726_v61  ;;  %v3033_v52 = vpack.c.bf16 %v2997_v44, %v2997_v44  ;;  %v4499_v32 = vsel %vm3076_vm3, %v4494_v2, 0 }
 0x467   :  { %v6258_v7 = vpop.eup %6257  ;;  %v3034_v6 = vpack.c.bf16 %v2999_v43, %v2999_v43 }
 0x468   :  { %v3001_v16 = vmul.f32 %v6258_v7, %v7156_v38  ;;  %v4543_v18 = vpop.permute.xlu0 %4542  ;;  %v6260_v58 = vpop.eup %6259 }
 0x469   :  { %5982 = vmatmul.mubr.msk.bf16.vlgmr.msra.gmra.mrb[88].mxu1 %vm223_vm2, %v3032_v54  ;;  %v4548_v40 = vsel %vm3076_vm3, %v4543_v18, 0  ;;  %v4592_v35 = vpop.permute.xlu1 %4591  ;;  %v3003_v31 = vmul.f32 %v6260_v58, %v7162_v1 }
 0x46a   :  { %5992 = vmatpush3.bf16.msra.mxu1 %v4450_v50  ;;  %5993 = vmatprep.mubr.msk.bf16.mxu1 %vm6305_vm1, %v7726_v61  ;;  %v3035_v0 = vpack.c.bf16 %v3001_v16, %v3001_v16  ;;  %v4597_v38 = vsel %vm3076_vm3, %v4592_v35, 0 }
 0x46b   :  { %6003 = vmatprep.subr.bf16.mxu1 %v7726_v61  ;;  %v6262_v55 = vpop.eup %6261  ;;  %v3036_v8 = vpack.c.bf16 %v3003_v31, %v3003_v31 }
 0x46c   :  { %5988 = vmatmul.mubr.msk.bf16.vlgmr.msra.gmra.mrb[92].mxu0 %vm223_vm2, %v3033_v52  ;;  %v3005_v5 = vmul.f32 %v6262_v55, %v7173_v56 }
 0x46d   :  { %5998 = vmatpush3.bf16.msra.mxu0 %v4499_v32  ;;  %5999 = vmatprep.mubr.msk.bf16.mxu0 %vm6305_vm1, %v7726_v61 }
 0x46e   :  { %6009 = vmatprep.subr.bf16.mxu0 %v7726_v61  ;;  %v3037_v14 = vpack.c.bf16 %v3005_v5, %v3005_v5 }
 0x471   :  { %5994 = vmatmul.mubr.msk.bf16.vlgmr.msra.gmra.mrb[92].mxu1 %vm223_vm2, %v3034_v6 }
 0x472   :  { %6004 = vmatpush3.bf16.msra.mxu1 %v4548_v40  ;;  %6005 = vmatprep.mubr.msk.bf16.mxu1 %vm6305_vm1, %v7726_v61 }
 0x474   :  { %6000 = vmatmul.mubr.msk.bf16.vlgmr.msra.gmra.mrb[96].mxu0 %vm223_vm2, %v3035_v0 }
 0x475   :  { %6010 = vmatpush3.bf16.msra.mxu0 %v4597_v38  ;;  %6011 = vmatprep.mubr.msk.bf16.mxu0 %vm6305_vm1, %v7726_v61 }
 0x479   :  { %6006 = vmatmul.mubr.msk.bf16.vlgmr.msra.gmra.mrb[96].mxu1 %vm223_vm2, %v3036_v8 }
 0x47c   :  { %6012 = vmatmul.mubr.msk.bf16.vlgmr.msra.gmra.mrb[100].mxu0 %vm223_vm2, %v3037_v14 }
 0x49b   :  { %v7387_v13 = vpop.f32.mrb[36].mxu1 }
 0x49c   :  { %v5827_v9 = vpop.f32.mrb[37].mxu1 }
 0x49d   :  { %v3117_v1 = vpop.f32.mrb[38].mxu1 }
 0x49e   :  { %v5828_v36 = vpop.f32.mrb[39].mxu1  ;;  %v7389_v42 = vpop.f32.mrb[40].mxu0 }
 0x49f   :  { %v5833_v39 = vpop.f32.mrb[41].mxu0 }
 0x4a0   :  { %v3166_v20 = vpop.f32.mrb[42].mxu0 }
 0x4a1   :  { %v5834_v22 = vpop.f32.mrb[43].mxu0 }
 0x4a4   :  { %v7391_v15 = vpop.f32.mrb[40].mxu1 }
 0x4a5   :  { %v5839_v61 = vpop.f32.mrb[41].mxu1 }
 0x4a6   :  { %v3215_v56 = vpop.f32.mrb[42].mxu1 }
 0x4a7   :  { %v5840_v33 = vpop.f32.mrb[43].mxu1  ;;  %v7393_v10 = vpop.f32.mrb[44].mxu0 }
 0x4a8   :  { %v5845_v60 = vpop.f32.mrb[45].mxu0 }
 0x4a9   :  { %v3264_v48 = vpop.f32.mrb[46].mxu0 }
 0x4aa   :  { %v5846_v47 = vpop.f32.mrb[47].mxu0 }
 0x4ac   :  { %v7395_v30 = vpop.f32.mrb[44].mxu1 }
 0x4ad   :  { %v5851_v37 = vpop.f32.mrb[45].mxu1 }
 0x4ae   :  { %v3313_v19 = vpop.f32.mrb[46].mxu1 }
 0x4af   :  { %v5852_v46 = vpop.f32.mrb[47].mxu1  ;;  %v7397_v53 = vpop.f32.mrb[48].mxu0 }
 0x4b0   :  { %v5857_v57 = vpop.f32.mrb[49].mxu0 }
 0x4b1   :  { %v3362_v12 = vpop.f32.mrb[50].mxu0 }
 0x4b2   :  { %v5858_v49 = vpop.f32.mrb[51].mxu0 }
 0x4b4   :  { %v7399_v62 = vpop.f32.mrb[48].mxu1 }
 0x4b5   :  { %v5863_v23 = vpop.f32.mrb[49].mxu1 }
 0x4b6   :  { %v3411_v4 = vpop.f32.mrb[50].mxu1 }
 0x4b7   :  { %v5864_v21 = vpop.f32.mrb[51].mxu1  ;;  %v7401_v45 = vpop.f32.mrb[52].mxu0 }
 0x4b8   :  { %v5869_v11 = vpop.f32.mrb[53].mxu0 }
 0x4b9   :  { %v3460_v63 = vpop.f32.mrb[54].mxu0 }
 0x4ba   :  { %v5870_v24 = vpop.f32.mrb[55].mxu0 }
 0x4bc   :  { %v3506_v34 = vpop.f32.mrb[52].mxu1 }
 0x4bd   :  { %v5875_v28 = vpop.f32.mrb[53].mxu1 }
 0x4be   :  { %v3509_v3 = vpop.f32.mrb[54].mxu1 }
 0x4bf   :  { %v5876_v26 = vpop.f32.mrb[55].mxu1  ;;  %v3555_v41 = vpop.f32.mrb[56].mxu0 }
 0x4c0   :  { %v6065_v29 = vpack.i.bf16 %v3555_v41, %v3506_v34  ;;  %v5881_v17 = vpop.f32.mrb[57].mxu0 }
 0x4c1   :  { %v3558_v51 = vpop.f32.mrb[58].mxu0 }
 0x4c2   :  { %v5882_v59 = vpop.f32.mrb[59].mxu0  ;;  %6066 = vrot.lane.b32.xlu0 %v6065_v29, %s6310_s26 }
 0x4c4   :  { %v3604_v44 = vpop.f32.mrb[56].mxu1 }
 0x4c5   :  { %v5887_v25 = vpop.f32.mrb[57].mxu1 }
 0x4c6   :  { %v3607_v54 = vpop.f32.mrb[58].mxu1 }
 0x4c7   :  { %v5888_v27 = vpop.f32.mrb[59].mxu1  ;;  %v3653_v50 = vpop.f32.mrb[60].mxu0 }
 0x4c8   :  { %v6070_v2 = vpack.i.bf16 %v3653_v50, %v3604_v44  ;;  %v5893_v52 = vpop.f32.mrb[61].mxu0 }
 0x4c9   :  { %v3656_v7 = vpop.f32.mrb[62].mxu0 }
 0x4ca   :  { %v5894_v43 = vpop.f32.mrb[63].mxu0  ;;  %6071 = vrot.lane.b32.xlu1 %v6070_v2, %s6310_s26  ;;  %v6127_v7 = vld [vmem:[%s7707_s3] sm:$0xff]  }
 0x4cb   :  { %6015 = vmatprep.subr.bf16.mxu1 %v6127_v7 }
 0x4cc   :  { %6016 = vmatpush3.bf16.msra.mxu1 %v6127_v7 }
 0x4ea   :  { %v3702_v32 = vpop.f32.mrb[60].mxu1 }
 0x4eb   :  { %v5899_v16 = vpop.f32.mrb[61].mxu1 }
 0x4ec   :  { %v3705_v18 = vpop.f32.mrb[62].mxu1 }
 0x4ed   :  { %v5900_v6 = vpop.f32.mrb[63].mxu1 }
 0x4ee   :  { %v3751_v58 = vpop.f32.mrb[64].mxu0 }
 0x4ef   :  { %v6075_v40 = vpack.i.bf16 %v3751_v58, %v3702_v32  ;;  %v5905_v35 = vpop.f32.mrb[65].mxu0  ;;  %v6128_v58 = vld [vmem:[%s7707_s3 + $0x8] sm:$0xff]  }
 0x4f0   :  { %v3754_v0 = vpop.f32.mrb[66].mxu0  ;;  %6017 = vmatprep.subr.bf16.mxu1 %v6128_v58 }
 0x4f1   :  { %v5906_v55 = vpop.f32.mrb[67].mxu0  ;;  %6076 = vrot.lane.b32.xlu0 %v6075_v40, %s6310_s26  ;;  %6018 = vmatpush3.bf16.msra.mxu1 %v6128_v58 }
 0x4f2   :  { %v3800_v31 = vpop.f32.mrb[64].mxu1 }
 0x4f3   :  { %v5911_v38 = vpop.f32.mrb[65].mxu1 }
 0x4f4   :  { %v3803_v5 = vpop.f32.mrb[66].mxu1 }
 0x4f5   :  { %v5912_v8 = vpop.f32.mrb[67].mxu1 }
 0x4f6   :  { %v3849_v14 = vpop.f32.mrb[68].mxu0 }
 0x4f7   :  { %v6080_v9 = vpack.i.bf16 %v3849_v14, %v3800_v31  ;;  %v5917_v1 = vpop.f32.mrb[69].mxu0 }
 0x4f8   :  { %v3852_v36 = vpop.f32.mrb[70].mxu0 }
 0x4f9   :  { %v5918_v39 = vpop.f32.mrb[71].mxu0  ;;  %6081 = vrot.lane.b32.xlu1 %v6080_v9, %s6310_s26 }
 0x4fa   :  { %v3898_v20 = vpop.f32.mrb[68].mxu1 }
 0x4fb   :  { %v5923_v22 = vpop.f32.mrb[69].mxu1 }
 0x4fc   :  { %v3901_v61 = vpop.f32.mrb[70].mxu1 }
 0x4fd   :  { %v5924_v56 = vpop.f32.mrb[71].mxu1 }
 0x4fe   :  { %v3947_v33 = vpop.f32.mrb[72].mxu0 }
 0x4ff   :  { %v6085_v60 = vpack.i.bf16 %v3947_v33, %v3898_v20  ;;  %v5929_v48 = vpop.f32.mrb[73].mxu0 }
 0x500   :  { %v3950_v47 = vpop.f32.mrb[74].mxu0 }
 0x501   :  { %v5930_v37 = vpop.f32.mrb[75].mxu0  ;;  %6086 = vrot.lane.b32.xlu0 %v6085_v60, %s6311_s27 }
 0x502   :  { %v3996_v19 = vpop.f32.mrb[72].mxu1 }
 0x503   :  { %v5935_v46 = vpop.f32.mrb[73].mxu1 }
 0x504   :  { %v3999_v57 = vpop.f32.mrb[74].mxu1 }
 0x505   :  { %v5936_v12 = vpop.f32.mrb[75].mxu1 }
 0x506   :  { %v4045_v49 = vpop.f32.mrb[76].mxu0 }
 0x507   :  { %v6090_v23 = vpack.i.bf16 %v4045_v49, %v3996_v19  ;;  %v5941_v4 = vpop.f32.mrb[77].mxu0 }
 0x508   :  { %v4048_v21 = vpop.f32.mrb[78].mxu0 }
 0x509   :  { %v5942_v11 = vpop.f32.mrb[79].mxu0  ;;  %6091 = vrot.lane.b32.xlu1 %v6090_v23, %s6311_s27 }
 0x50a   :  { %v4094_v63 = vpop.f32.mrb[76].mxu1 }
 0x50b   :  { %v5947_v24 = vpop.f32.mrb[77].mxu1 }
 0x50c   :  { %v4097_v34 = vpop.f32.mrb[78].mxu1 }
 0x50d   :  { %v5948_v28 = vpop.f32.mrb[79].mxu1 }
 0x50e   :  { %v4143_v3 = vpop.f32.mrb[80].mxu0 }
 0x50f   :  { %v6100_v26 = vpack.i.bf16 %v4143_v3, %v4094_v63  ;;  %v5953_v41 = vpop.f32.mrb[81].mxu0 }
 0x510   :  { %v4146_v29 = vpop.f32.mrb[82].mxu0 }
 0x511   :  { %v5954_v17 = vpop.f32.mrb[83].mxu0 }
 0x512   :  { %v4192_v51 = vpop.f32.mrb[80].mxu1 }
 0x513   :  { %v5959_v59 = vpop.f32.mrb[81].mxu1 }
 0x514   :  { %v4195_v44 = vpop.f32.mrb[82].mxu1 }
 0x515   :  { %v5960_v25 = vpop.f32.mrb[83].mxu1 }
 0x516   :  { %v4241_v54 = vpop.f32.mrb[84].mxu0 }
 0x517   :  { %v6110_v27 = vpack.i.bf16 %v4241_v54, %v4192_v51  ;;  %v5965_v50 = vpop.f32.mrb[85].mxu0 }
 0x518   :  { %v4244_v2 = vpop.f32.mrb[86].mxu0 }
 0x519   :  { %v5966_v52 = vpop.f32.mrb[87].mxu0 }
 0x534   :  { %v4290_v43 = vpop.f32.mrb[84].mxu1  ;;  %v6067_v63 = vpop.permute.xlu0 %6066 }
 0x535   :  { %v5971_v32 = vpop.f32.mrb[85].mxu1  ;;  %v6069_v3 = vunpack.i.h.bf16 %v6067_v63 }
 0x536   :  { %v4293_v16 = vpop.f32.mrb[86].mxu1 }
 0x537   :  { %v5972_v18 = vpop.f32.mrb[87].mxu1  ;;  %v4339_v6 = vpop.f32.mrb[88].mxu0  ;;  %v4736_v59 = vsel %vm223_vm2, %v7389_v42, %v6069_v3 }
 0x538   :  { %v6095_v40 = vpack.i.bf16 %v4339_v6, %v4290_v43  ;;  %v5977_v35 = vpop.f32.mrb[89].mxu0 }
 0x539   :  { %v4342_v0 = vpop.f32.mrb[90].mxu0 }
 0x53a   :  { %v5978_v55 = vpop.f32.mrb[91].mxu0  ;;  %6096 = vrot.lane.b32.xlu0 %v6095_v40, %s6312_s9 }
 0x53c   :  { %v4388_v31 = vpop.f32.mrb[88].mxu1  ;;  %v6072_v34 = vpop.permute.xlu1 %6071 }
 0x53d   :  { %v5983_v38 = vpop.f32.mrb[89].mxu1  ;;  %v6074_v32 = vunpack.i.h.bf16 %v6072_v34  ;;  %v6073_v16 = vunpack.i.l.bf16 %v6072_v34  ;;  %v4769_v34 = vlaneseq }
 0x53e   :  { %v4391_v5 = vpop.f32.mrb[90].mxu1  ;;  %6101 = vrot.lane.b32.xlu0 %v6100_v26, %s6311_s27  ;;  %v6068_v26 = vunpack.i.l.bf16 %v6067_v63 }
 0x53f   :  { %v5984_v8 = vpop.f32.mrb[91].mxu1  ;;  %v4437_v14 = vpop.f32.mrb[92].mxu0  ;;  %v4737_v58 = vsel %vm223_vm2, %v7391_v15, %v6073_v16  ;;  %v6298_v16 = vld [vmem:[%s7705_s0 + $0x18] sm:$0xff] }
 0x540   :  { %v6105_v9 = vpack.i.bf16 %v4437_v14, %v4388_v31  ;;  %v5989_v1 = vpop.f32.mrb[93].mxu0  ;;  %v4735_v44 = vsel %vm223_vm2, %v7387_v13, %v6068_v26  ;;  %v4738_v13 = vsel %vm223_vm2, %v7393_v10, %v6074_v32 }
 0x541   :  { %v4440_v36 = vpop.f32.mrb[94].mxu0 }
 0x542   :  { %6106 = vrot.lane.b32.xlu1 %v6105_v9, %s6312_s9  ;;  %v5990_v39 = vpop.f32.mrb[95].mxu0 }
 0x544   :  { %v4486_v20 = vpop.f32.mrb[92].mxu1 }
 0x545   :  { %v5995_v22 = vpop.f32.mrb[93].mxu1 }
 0x546   :  { %v4489_v61 = vpop.f32.mrb[94].mxu1  ;;  %6111 = vrot.lane.b32.xlu1 %v6110_v27, %s6311_s27 }
 0x547   :  { %v5996_v56 = vpop.f32.mrb[95].mxu1  ;;  %v4535_v33 = vpop.f32.mrb[96].mxu0 }
 0x548   :  { %v6115_v60 = vpack.i.bf16 %v4535_v33, %v4486_v20  ;;  %v6001_v48 = vpop.f32.mrb[97].mxu0 }
 0x549   :  { %v4538_v47 = vpop.f32.mrb[98].mxu0 }
 0x54a   :  { %6116 = vrot.lane.b32.xlu0 %v6115_v60, %s6312_s9  ;;  %v6002_v37 = vpop.f32.mrb[99].mxu0 }
 0x54c   :  { %v4584_v19 = vpop.f32.mrb[96].mxu1 }
 0x54d   :  { %v6007_v46 = vpop.f32.mrb[97].mxu1 }
 0x54e   :  { %v4587_v57 = vpop.f32.mrb[98].mxu1 }
 0x54f   :  { %v6008_v12 = vpop.f32.mrb[99].mxu1  ;;  %v4633_v49 = vpop.f32.mrb[100].mxu0 }
 0x550   :  { %v6120_v23 = vpack.i.bf16 %v4633_v49, %v4584_v19  ;;  %v6013_v4 = vpop.f32.mrb[101].mxu0 }
 0x551   :  { %v4636_v21 = vpop.f32.mrb[102].mxu0 }
 0x552   :  { %6121 = vrot.lane.b32.xlu1 %v6120_v23, %s6312_s9  ;;  %v6014_v11 = vpop.f32.mrb[103].mxu0 }
 0x563   :  { %v6077_v24 = vpop.permute.xlu0 %6076 }
 0x564   :  { %v6079_v14 = vunpack.i.h.bf16 %v6077_v24  ;;  %v6078_v9 = vunpack.i.l.bf16 %v6077_v24 }
 0x566   :  { %v4740_v15 = vsel %vm223_vm2, %v7397_v53, %v6079_v14  ;;  %v4739_v39 = vsel %vm223_vm2, %v7395_v30, %v6078_v9  ;;  %v6300_v14 = vld [vmem:[%s7705_s0 + $0x30] sm:$0xff] }
 0x56b   :  { %v6082_v17 = vpop.permute.xlu1 %6081 }
 0x56c   :  { %v6084_v37 = vunpack.i.h.bf16 %v6082_v17  ;;  %v6083_v19 = vunpack.i.l.bf16 %v6082_v17 }
 0x56e   :  { %v4742_v30 = vsel %vm223_vm2, %v7401_v45, %v6084_v37  ;;  %v4741_v12 = vsel %vm223_vm2, %v7399_v62, %v6083_v19  ;;  %v7463_v62 = vld [vmem:[%s7708_s6] sm:$0x7f] }
 0x573   :  { %v6087_v28 = vpop.permute.xlu0 %6086 }
 0x574   :  { %v6089_v41 = vunpack.i.h.bf16 %v6087_v28  ;;  %v6088_v29 = vunpack.i.l.bf16 %v6087_v28  ;;  %v7457_v28 = vshrl.u32 %v4769_v34, 7 }
 0x576   :  { %v4745_v27 = vsel %vm4743_vm4, %v4736_v59, %v6089_v41  ;;  %v4744_v50 = vsel %vm4743_vm4, %v4735_v44, %v6088_v29  ;;  %v4771_v45 = vsub.s32 0, %v7457_v28  ;;  %v6295_v44 = vld [vmem:[%s7705_s0] sm:$0xff] }
 0x578   :  { %v4772_v3 = vrot.slane %v7463_v62, %v4771_v45 }
 0x57b   :  { %v6092_v2 = vpop.permute.xlu1 %6091 }
 0x57c   :  { %v6094_v18 = vunpack.i.h.bf16 %v6092_v2  ;;  %v6093_v6 = vunpack.i.l.bf16 %v6092_v2 }
 0x57e   :  { %v4746_v0 = vsel %vm4743_vm4, %v4737_v58, %v6093_v6  ;;  %v4747_v55 = vsel %vm4743_vm4, %v4738_v13, %v6094_v18 }
 0x5ac   :  { %v6097_v51 = vpop.permute.xlu0 %6096 }
 0x5ad   :  { %v6099_v25 = vunpack.i.h.bf16 %v6097_v51  ;;  %v6098_v54 = vunpack.i.l.bf16 %v6097_v51 }
 0x5af   :  { %v4754_v52 = vsel %vm4752_vm5, %v4745_v27, %v6099_v25  ;;  %v4753_v7 = vsel %vm4752_vm5, %v4744_v50, %v6098_v54  ;;  %v6296_v27 = vld [vmem:[%s7705_s0 + $0x10] sm:$0xff] }
 0x5b0   :  { %v4761_v43 = vpack.c.bf16 %v4754_v52, %v4753_v7  ;;  %v6102_v31 = vpop.permute.xlu0 %6101  ;;  %v6297_v52 = vld [vmem:[%s7705_s0 + $0x8] sm:$0xff] }
 0x5b1   :  { %v6104_v1 = vunpack.i.h.bf16 %v6102_v31  ;;  %v6103_v36 = vunpack.i.l.bf16 %v6102_v31  ;;  %v6299_v31 = vld [vmem:[%s7705_s0 + $0x20] sm:$0xff] }
 0x5b2   :  { %6019 = vmatprep.mubr.msk.bf16.mxu1 %vm63_vm0, %v4761_v43 }
 0x5b3   :  { %v4749_v61 = vsel %vm4743_vm4, %v4740_v15, %v6104_v1  ;;  %v4748_v56 = vsel %vm4743_vm4, %v4739_v39, %v6103_v36  ;;  %v6301_v1 = vld [vmem:[%s7705_s0 + $0x28] sm:$0xff]  ;;  %v6302_v15 = vld [vmem:[%s7705_s0 + $0x38] sm:$0xff] }
 0x5b4   :  { %v6107_v42 = vpop.permute.xlu1 %6106 }
 0x5b5   :  { %v6109_v40 = vunpack.i.h.bf16 %v6107_v42  ;;  %v6108_v35 = vunpack.i.l.bf16 %v6107_v42 }
 0x5b7   :  { %v4755_v38 = vsel %vm4752_vm5, %v4746_v0, %v6108_v35  ;;  %v4756_v5 = vsel %vm4752_vm5, %v4747_v55, %v6109_v40 }
 0x5b8   :  { %v4762_v8 = vpack.c.bf16 %v4756_v5, %v4755_v38  ;;  %v6112_v33 = vpop.permute.xlu1 %6111 }
 0x5b9   :  { %v6114_v46 = vunpack.i.h.bf16 %v6112_v33  ;;  %v6113_v57 = vunpack.i.l.bf16 %v6112_v33 }
 0x5ba   :  { %6020 = vmatmul.mubr.msk.bf16.vlgmr.msra.gmra.mrb[100].mxu1 %vm63_vm0, %v4762_v8 }
 0x5bb   :  { %v4750_v4 = vsel %vm4743_vm4, %v4741_v12, %v6113_v57  ;;  %v4751_v21 = vsel %vm4743_vm4, %v4742_v30, %v6114_v46 }
 0x5bc   :  { %v6117_v10 = vpop.permute.xlu0 %6116 }
 0x5bd   :  { %v6119_v20 = vunpack.i.h.bf16 %v6117_v10  ;;  %v6118_v22 = vunpack.i.l.bf16 %v6117_v10 }
 0x5bf   :  { %v4758_v60 = vsel %vm4752_vm5, %v4749_v61, %v6119_v20  ;;  %v4757_v48 = vsel %vm4752_vm5, %v4748_v56, %v6118_v22 }
 0x5c0   :  { %v4763_v47 = vpack.c.bf16 %v4758_v60, %v4757_v48 }
 0x5c2   :  { %6023 = vmatprep.mubr.msk.bf16.mxu1 %vm63_vm0, %v4763_v47 }
 0x5c4   :  { %v6122_v53 = vpop.permute.xlu1 %6121 }
 0x5c5   :  { %v6124_v49 = vunpack.i.h.bf16 %v6122_v53  ;;  %v6123_v23 = vunpack.i.l.bf16 %v6122_v53 }
 0x5c7   :  { %v4759_v11 = vsel %vm4752_vm5, %v4750_v4, %v6123_v23  ;;  %v4760_v63 = vsel %vm4752_vm5, %v4751_v21, %v6124_v49 }
 0x5c8   :  { %v4764_v24 = vpack.c.bf16 %v4760_v63, %v4759_v11 }
 0x5ca   :  { %6024 = vmatmul.mubr.msk.bf16.gmra.mrb[104].mxu1 %vm63_vm0, %v4764_v24 }
 0x68d   :  { %v6021_v26 = vpop.f32.mrb[100].mxu1 }
 0x68e   :  { %v4831_v41 = vpop.f32.mrb[101].mxu1  ;;  %v4840_v29 = vadd.f32 %v6021_v26, %v4772_v3 }
 0x68f   :  { %v4832_v17 = vadd.f32 %v4831_v41, %v4772_v3  ;;  %v6022_v51 = vpop.f32.mrb[102].mxu1 }
 0x690   :  { %v4834_v59 = vpop.f32.mrb[103].mxu1  ;;  %v4864_v50 = vadd.f32 %v6296_v27, %v4840_v29  ;;  %v4843_v2 = vadd.f32 %v6022_v51, %v4772_v3 }
 0x691   :  { %v4862_v25 = vadd.f32 %v6295_v44, %v4832_v17  ;;  %v4835_v54 = vadd.f32 %v4834_v59, %v4772_v3 }
 0x692   :  { %v4865_v18 = vadd.f32 %v6298_v16, %v4843_v2  ;;  %v4876_v6 = vsel %vm63_vm0, %v4864_v50, 0.0 }
 0x693   :  { %v4863_v7 = vadd.f32 %v6297_v52, %v4835_v54  ;;  %v4870_v43 = vsel %vm63_vm0, %v4862_v25, 0.0 }
 0x694   :  { %4871 = vadd.xlane.f32.xlu0 %v4870_v43  ;;  %v4879_v42 = vsel %vm63_vm0, %v4865_v18, 0.0 }
 0x695   :  { %v4873_v32 = vsel %vm63_vm0, %v4863_v7, 0.0 }
 0x696   :  { %4874 = vadd.xlane.f32.xlu1 %v4873_v32 }
 0x698   :  { %4877 = vadd.xlane.f32.xlu0 %v4876_v6  ;;  %v6129_v6 = vld [vmem:[%s7709_s4] sm:$0xff]  }
 0x699   :  { %6027 = vmatprep.subr.bf16.mxu0 %v6129_v6 }
 0x69a   :  { %6028 = vmatpush3.bf16.msra.mxu0 %v6129_v6 }
 0x69c   :  { %4880 = vadd.xlane.f32.xlu0 %v4879_v42  ;;  %v6130_v42 = vld [vmem:[%s7709_s4 + $0x8] sm:$0xff]  }
 0x69d   :  { %v6025_v13 = vpop.f32.mrb[104].mxu1  ;;  %6029 = vmatprep.subr.bf16.mxu0 %v6130_v42 }
 0x69e   :  { %v4847_v58 = vpop.f32.mrb[105].mxu1  ;;  %v4856_v40 = vadd.f32 %v6025_v13, %v4772_v3  ;;  %6030 = vmatpush3.bf16.msra.mxu0 %v6130_v42  ;;  %v6131_v13 = vld [vmem:[%s7710_s5] sm:$0xff]  }
 0x69f   :  { %v4848_v35 = vadd.f32 %v4847_v58, %v4772_v3  ;;  %v6026_v0 = vpop.f32.mrb[106].mxu1  ;;  %v6132_v58 = vld [vmem:[%s7710_s5 + $0x8] sm:$0xff]   ;;  %6039 = vmatprep.subr.bf16.mxu1 %v6131_v13 }
 0x6a0   :  { %v4850_v55 = vpop.f32.mrb[107].mxu1  ;;  %v4859_v5 = vadd.f32 %v6026_v0, %v4772_v3  ;;  %v4868_v9 = vadd.f32 %v6300_v14, %v4856_v40  ;;  %6040 = vmatpush3.bf16.msra.mxu1 %v6131_v13 }
 0x6a1   :  { %v4866_v38 = vadd.f32 %v6299_v31, %v4848_v35  ;;  %v4851_v8 = vadd.f32 %v4850_v55, %v4772_v3  ;;  %6041 = vmatprep.subr.bf16.mxu1 %v6132_v58 }
 0x6a2   :  { %v4869_v39 = vadd.f32 %v6302_v15, %v4859_v5  ;;  %v4888_v22 = vsel %vm63_vm0, %v4868_v9, 0.0 }
 0x6a3   :  { %v4867_v36 = vadd.f32 %v6301_v1, %v4851_v8  ;;  %v4882_v10 = vsel %vm63_vm0, %v4866_v38, 0.0 }
 0x6a4   :  { %4883 = vadd.xlane.f32.xlu1 %v4882_v10  ;;  %v4891_v61 = vsel %vm63_vm0, %v4869_v39, 0.0  ;;  %6042 = vmatpush3.bf16.msra.mxu1 %v6132_v58 }
 0x6a5   :  { %v4885_v20 = vsel %vm63_vm0, %v4867_v36, 0.0 }
 0x6a6   :  { %4886 = vadd.xlane.f32.xlu0 %v4885_v20 }
 0x6a8   :  { %4889 = vadd.xlane.f32.xlu1 %v4888_v22 }
 0x6aa   :  { %4892 = vadd.xlane.f32.xlu0 %v4891_v61 }
 0x721   :  { %v4872_v56 = vpop.xlane.xlu0 %4871 }
 0x722   :  { %v4895_v33 = vmul.f32 0.03125, %v4872_v56 }
 0x723   :  { %v4875_v60 = vpop.xlane.xlu1 %4874 }
 0x724   :  { %v7498_v48 = vsub.f32 %v4862_v25, %v4895_v33  ;;  %v4896_v47 = vmul.f32 0.03125, %v4875_v60 }
 0x725   :  { %v4878_v37 = vpop.xlane.xlu0 %4877 }
 0x726   :  { %v7500_v19 = vsub.f32 %v4863_v7, %v4896_v47  ;;  %v4897_v46 = vmul.f32 0.03125, %v4878_v37  ;;  %v4911_v57 = vmul.f32 %v7498_v48, %v7498_v48 }
 0x728   :  { %v7504_v53 = vsub.f32 %v4864_v50, %v4897_v46  ;;  %v4919_v30 = vsel %vm63_vm0, %v4911_v57, 0.0  ;;  %v4912_v12 = vmul.f32 %v7500_v19, %v7500_v19 }
 0x729   :  { %4920 = vadd.xlane.f32.xlu1 %v4919_v30  ;;  %v4881_v49 = vpop.xlane.xlu0 %4880 }
 0x72a   :  { %v4898_v23 = vmul.f32 0.03125, %v4881_v49  ;;  %v4922_v4 = vsel %vm63_vm0, %v4912_v12, 0.0  ;;  %v4913_v21 = vmul.f32 %v7504_v53, %v7504_v53 }
 0x72b   :  { %4923 = vadd.xlane.f32.xlu0 %v4922_v4 }
 0x72c   :  { %v7512_v11 = vsub.f32 %v4865_v18, %v4898_v23  ;;  %v4925_v63 = vsel %vm63_vm0, %v4913_v21, 0.0 }
 0x72d   :  { %4926 = vadd.xlane.f32.xlu1 %v4925_v63 }
 0x72e   :  { %v4914_v24 = vmul.f32 %v7512_v11, %v7512_v11 }
 0x730   :  { %v4928_v34 = vsel %vm63_vm0, %v4914_v24, 0.0 }
 0x731   :  { %v4884_v45 = vpop.xlane.xlu1 %4883  ;;  %4929 = vadd.xlane.f32.xlu0 %v4928_v34 }
 0x732   :  { %v4899_v3 = vmul.f32 0.03125, %v4884_v45 }
 0x733   :  { %v4887_v26 = vpop.xlane.xlu0 %4886 }
 0x734   :  { %v7518_v41 = vsub.f32 %v4866_v38, %v4899_v3  ;;  %v4900_v29 = vmul.f32 0.03125, %v4887_v26 }
 0x735   :  { %v4890_v17 = vpop.xlane.xlu1 %4889 }
 0x736   :  { %v7520_v51 = vsub.f32 %v4867_v36, %v4900_v29  ;;  %v4901_v59 = vmul.f32 0.03125, %v4890_v17  ;;  %v4915_v44 = vmul.f32 %v7518_v41, %v7518_v41  ;;  %v4977_v36 = vsub.s32 3, %v7457_v28 }
 0x737   :  { %v4893_v25 = vpop.xlane.xlu0 %4892 }
 0x738   :  { %v7524_v54 = vsub.f32 %v4868_v9, %v4901_v59  ;;  %v4902_v27 = vmul.f32 0.03125, %v4893_v25  ;;  %v4931_v50 = vsel %vm63_vm0, %v4915_v44, 0.0  ;;  %v4916_v2 = vmul.f32 %v7520_v51, %v7520_v51 }
 0x739   :  { %4932 = vadd.xlane.f32.xlu1 %v4931_v50  ;;  %v4978_v15 = vrot.slane %v7463_v62, %v4977_v36 }
 0x73a   :  { %v7529_v52 = vsub.f32 %v4869_v39, %v4902_v27  ;;  %v4934_v7 = vsel %vm63_vm0, %v4916_v2, 0.0  ;;  %v4917_v43 = vmul.f32 %v7524_v54, %v7524_v54  ;;  %v4989_v39 = vsub.s32 4, %v7457_v28 }
 0x73b   :  { %4935 = vadd.xlane.f32.xlu0 %v4934_v7 }
 0x73c   :  { %v4937_v32 = vsel %vm63_vm0, %v4917_v43, 0.0  ;;  %v4918_v16 = vmul.f32 %v7529_v52, %v7529_v52  ;;  %v4990_v46 = vrot.slane %v7463_v62, %v4989_v39 }
 0x73d   :  { %4938 = vadd.xlane.f32.xlu1 %v4937_v32 }
 0x73e   :  { %v4940_v18 = vsel %vm63_vm0, %v4918_v16, 0.0 }
 0x73f   :  { %4941 = vadd.xlane.f32.xlu0 %v4940_v18 }
 0x7b6   :  { %v4921_v40 = vpop.xlane.xlu1 %4920 }
 0x7b7   :  { %v4943_v35 = vmul.f32 0.03125, %v4921_v40 }
 0x7b8   :  { %v4924_v0 = vpop.xlane.xlu0 %4923 }
 0x7b9   :  { %v4951_v55 = vadd.f32 1e-05, %v4943_v35  ;;  %v4944_v31 = vmul.f32 0.03125, %v4924_v0 }
 0x7ba   :  { %v4927_v38 = vpop.xlane.xlu1 %4926 }
 0x7bb   :  { %6263 = vrsqrt.f32 %v4951_v55  ;;  %v4952_v5 = vadd.f32 1e-05, %v4944_v31  ;;  %v4945_v8 = vmul.f32 0.03125, %v4927_v38  ;;  %v6134_v55 = vld [vmem:[%s7710_s5 + $0x18] sm:$0xff]   ;;  %v5009_v31 = vsub.s32 1, %v7457_v28 }
 0x7bd   :  { %6265 = vrsqrt.f32 %v4952_v5  ;;  %v4953_v14 = vadd.f32 1e-05, %v4945_v8  ;;  %v5010_v38 = vrot.slane %v7463_v62, %v5009_v31 }
 0x7be   :  { %v4930_v9 = vpop.xlane.xlu0 %4929 }
 0x7bf   :  { %6267 = vrsqrt.f32 %v4953_v14  ;;  %v4946_v1 = vmul.f32 0.03125, %v4930_v9 }
 0x7c1   :  { %v4954_v10 = vadd.f32 1e-05, %v4946_v1 }
 0x7c3   :  { %6269 = vrsqrt.f32 %v4954_v10 }
 0x7c5   :  { %v6264_v20 = vpop.eup %6263 }
 0x7c6   :  { %v4967_v22 = vmul.f32 %v6264_v20, %v7498_v48  ;;  %v4933_v61 = vpop.xlane.xlu1 %4932 }
 0x7c7   :  { %v6266_v56 = vpop.eup %6265  ;;  %v4947_v33 = vmul.f32 0.03125, %v4933_v61 }
 0x7c8   :  { %v4968_v60 = vmul.f32 %v6266_v56, %v7500_v19  ;;  %v4936_v47 = vpop.xlane.xlu0 %4935  ;;  %v4979_v37 = vmul.f32 %v4978_v15, %v4967_v22 }
 0x7c9   :  { %v6268_v57 = vpop.eup %6267  ;;  %v4955_v30 = vadd.f32 1e-05, %v4947_v33  ;;  %v4948_v12 = vmul.f32 0.03125, %v4936_v47 }
 0x7ca   :  { %v4969_v49 = vmul.f32 %v6268_v57, %v7504_v53  ;;  %v4939_v23 = vpop.xlane.xlu1 %4938  ;;  %v4980_v4 = vmul.f32 %v4978_v15, %v4968_v60  ;;  %v7557_v24 = vadd.f32 %v4990_v46, %v4979_v37 }
 0x7cb   :  { %6271 = vrsqrt.f32 %v4955_v30  ;;  %v4956_v21 = vadd.f32 1e-05, %v4948_v12  ;;  %v4949_v63 = vmul.f32 0.03125, %v4939_v23 }
 0x7cc   :  { %v4942_v48 = vpop.xlane.xlu0 %4941  ;;  %v7559_v34 = vadd.f32 %v4990_v46, %v4980_v4  ;;  %v4981_v26 = vmul.f32 %v4978_v15, %v4969_v49 }
 0x7cd   :  { %v6270_v19 = vpop.eup %6269  ;;  %6273 = vrsqrt.f32 %v4956_v21  ;;  %v4957_v45 = vadd.f32 1e-05, %v4949_v63  ;;  %v4950_v3 = vmul.f32 0.03125, %v4942_v48 }
 0x7ce   :  { %v4970_v29 = vmul.f32 %v6270_v19, %v7512_v11  ;;  %v4999_v53 = vpack.c.bf16 %v7559_v34, %v7557_v24  ;;  %v7565_v44 = vadd.f32 %v4990_v46, %v4981_v26 }
 0x7cf   :  { %6275 = vrsqrt.f32 %v4957_v45  ;;  %v4958_v17 = vadd.f32 1e-05, %v4950_v3  ;;  %v5122_v45 = vsub.s32 2, %v7457_v28 }
 0x7d0   :  { %v4982_v59 = vmul.f32 %v4978_v15, %v4970_v29  ;;  %6031 = vmatprep.mubr.msk.bf16.mxu0 %vm63_vm0, %v4999_v53 }
 0x7d1   :  { %6277 = vrsqrt.f32 %v4958_v17  ;;  %v5123_v3 = vrot.slane %v7463_v62, %v5122_v45 }
 0x7d2   :  { %v7567_v25 = vadd.f32 %v4990_v46, %v4982_v59 }
 0x7d4   :  { %v5000_v27 = vpack.c.bf16 %v7567_v25, %v7565_v44 }
 0x7d5   :  { %v6272_v50 = vpop.eup %6271 }
 0x7d6   :  { %v4971_v2 = vmul.f32 %v6272_v50, %v7518_v41  ;;  %6032 = vmatmul.mubr.msk.bf16.vlgmr.msra.gmra.mrb[104].mxu0 %vm63_vm0, %v5000_v27 }
 0x7d7   :  { %v6274_v11 = vpop.eup %6273 }
 0x7d8   :  { %v4972_v7 = vmul.f32 %v6274_v11, %v7520_v51  ;;  %v4983_v43 = vmul.f32 %v4978_v15, %v4971_v2 }
 0x7d9   :  { %v6276_v32 = vpop.eup %6275 }
 0x7da   :  { %v4973_v16 = vmul.f32 %v6276_v32, %v7524_v54  ;;  %v4984_v18 = vmul.f32 %v4978_v15, %v4972_v7  ;;  %v7576_v13 = vadd.f32 %v4990_v46, %v4983_v43 }
 0x7db   :  { %v6278_v6 = vpop.eup %6277 }
 0x7dc   :  { %v4974_v42 = vmul.f32 %v6278_v6, %v7529_v52  ;;  %v7578_v58 = vadd.f32 %v4990_v46, %v4984_v18  ;;  %v4985_v40 = vmul.f32 %v4978_v15, %v4973_v16  ;;  %v6133_v52 = vld [vmem:[%s7710_s5 + $0x10] sm:$0xff]  }
 0x7dd   :  { %6043 = vmatprep.subr.bf16.mxu1 %v6133_v52 }
 0x7de   :  { %v5001_v41 = vpack.c.bf16 %v7578_v58, %v7576_v13  ;;  %v4986_v35 = vmul.f32 %v4978_v15, %v4974_v42  ;;  %v7583_v51 = vadd.f32 %v4990_v46, %v4985_v40  ;;  %6044 = vmatpush3.bf16.msra.mxu1 %v6133_v52 }
 0x7df   :  { %6045 = vmatprep.subr.bf16.mxu1 %v6134_v55 }
 0x7e0   :  { %6035 = vmatprep.mubr.msk.bf16.mxu0 %vm63_vm0, %v5001_v41  ;;  %v7585_v0 = vadd.f32 %v4990_v46, %v4986_v35 }
 0x7e2   :  { %v5002_v54 = vpack.c.bf16 %v7585_v0, %v7583_v51  ;;  %6046 = vmatpush3.bf16.msra.mxu1 %v6134_v55 }
 0x7e4   :  { %6036 = vmatmul.mubr.msk.bf16.gmra.mrb[108].mxu0 %vm63_vm0, %v5002_v54 }
 0x8a9   :  { %v6033_v5 = vpop.f32.mrb[104].mxu0 }
 0x8aa   :  { %v5078_v8 = vadd.f32 %v6033_v5, %v5010_v38  ;;  %v5069_v14 = vpop.f32.mrb[105].mxu0 }
 0x8ab   :  { %v5070_v9 = vadd.f32 %v5069_v14, %v5010_v38  ;;  %v6034_v1 = vpop.f32.mrb[106].mxu0 }
 0x8ac   :  { %v5081_v36 = vadd.f32 %v6034_v1, %v5010_v38  ;;  %v5072_v10 = vpop.f32.mrb[107].mxu0  ;;  %v5102_v39 = vmax.f32 %v5078_v8, 0.0 }
 0x8ad   :  { %v5073_v15 = vadd.f32 %v5072_v10, %v5010_v38  ;;  %v5100_v22 = vmax.f32 %v5070_v9, 0.0 }
 0x8ae   :  { %v5103_v20 = vmax.f32 %v5081_v36, 0.0 }
 0x8af   :  { %v5101_v61 = vmax.f32 %v5073_v15, 0.0 }
 0x8b0   :  { %v5109_v56 = vpack.c.bf16 %v5103_v20, %v5102_v39 }
 0x8b1   :  { %v5108_v33 = vpack.c.bf16 %v5101_v61, %v5100_v22 }
 0x8b3   :  { %6047 = vmatprep.mubr.msk.bf16.mxu1 %vm5148_vm6, %v5108_v33 }
 0x8b4   :  { %6048 = vmatmul.mubr.msk.bf16.vlgmr.msra.gmra.mrb[108].mxu1 %vm5148_vm6, %v5109_v56 }
 0x8b7   :  { %v6037_v60 = vpop.f32.mrb[108].mxu0 }
 0x8b8   :  { %v5094_v47 = vadd.f32 %v6037_v60, %v5010_v38  ;;  %v5085_v37 = vpop.f32.mrb[109].mxu0 }
 0x8b9   :  { %v5086_v46 = vadd.f32 %v5085_v37, %v5010_v38  ;;  %v6038_v57 = vpop.f32.mrb[110].mxu0 }
 0x8ba   :  { %v5097_v30 = vadd.f32 %v6038_v57, %v5010_v38  ;;  %v5088_v12 = vpop.f32.mrb[111].mxu0  ;;  %v5106_v23 = vmax.f32 %v5094_v47, 0.0 }
 0x8bb   :  { %v5089_v49 = vadd.f32 %v5088_v12, %v5010_v38  ;;  %v5104_v21 = vmax.f32 %v5086_v46, 0.0 }
 0x8bc   :  { %v5107_v4 = vmax.f32 %v5097_v30, 0.0 }
 0x8bd   :  { %v5105_v63 = vmax.f32 %v5089_v49, 0.0 }
 0x8be   :  { %v5111_v48 = vpack.c.bf16 %v5107_v4, %v5106_v23 }
 0x8bf   :  { %v5110_v19 = vpack.c.bf16 %v5105_v63, %v5104_v21 }
 0x8c1   :  { %6051 = vmatprep.mubr.msk.bf16.mxu1 %vm5148_vm6, %v5110_v19 }
 0x8c2   :  { %6052 = vmatmul.mubr.msk.bf16.gmra.mrb[112].mxu1 %vm5148_vm6, %v5111_v48 }
 0x987   :  { %v6049_v26 = vpop.f32.mrb[108].mxu1 }
 0x988   :  { %v5204_v29 = vadd.f32 %v6049_v26, %v5123_v3  ;;  %v5195_v53 = vpop.f32.mrb[109].mxu1 }
 0x989   :  { %v5196_v17 = vadd.f32 %v5195_v53, %v5123_v3  ;;  %v6050_v59 = vpop.f32.mrb[110].mxu1 }
 0x98a   :  { %v5228_v27 = vadd.f32 %v5204_v29, %v7565_v44  ;;  %v5207_v50 = vadd.f32 %v6050_v59, %v5123_v3  ;;  %v5198_v2 = vpop.f32.mrb[111].mxu1 }
 0x98b   :  { %v5199_v11 = vadd.f32 %v5198_v2, %v5123_v3  ;;  %v5226_v7 = vadd.f32 %v5196_v17, %v7557_v24 }
 0x98c   :  { %v5229_v43 = vadd.f32 %v5207_v50, %v7567_v25  ;;  %v5240_v32 = vsel %vm63_vm0, %v5228_v27, 0.0 }
 0x98d   :  { %5241 = vadd.xlane.f32.xlu1 %v5240_v32  ;;  %v5227_v16 = vadd.f32 %v5199_v11, %v7559_v34  ;;  %v5234_v6 = vsel %vm63_vm0, %v5226_v7, 0.0 }
 0x98e   :  { %v5243_v18 = vsel %vm63_vm0, %v5229_v43, 0.0 }
 0x98f   :  { %5244 = vadd.xlane.f32.xlu0 %v5243_v18  ;;  %v5237_v44 = vsel %vm63_vm0, %v5227_v16, 0.0 }
 0x991   :  { %5235 = vadd.xlane.f32.xlu1 %v5234_v6 }
 0x993   :  { %5238 = vadd.xlane.f32.xlu0 %v5237_v44 }
 0x995   :  { %v6053_v42 = vpop.f32.mrb[112].mxu1 }
 0x996   :  { %v5211_v40 = vpop.f32.mrb[113].mxu1  ;;  %v5220_v41 = vadd.f32 %v6053_v42, %v5123_v3 }
 0x997   :  { %v5212_v24 = vadd.f32 %v5211_v40, %v5123_v3  ;;  %v6054_v35 = vpop.f32.mrb[114].mxu1 }
 0x998   :  { %v5214_v25 = vpop.f32.mrb[115].mxu1  ;;  %v5223_v52 = vadd.f32 %v6054_v35, %v5123_v3  ;;  %v5232_v34 = vadd.f32 %v5220_v41, %v7583_v51 }
 0x999   :  { %v5230_v54 = vadd.f32 %v5212_v24, %v7576_v13  ;;  %v5215_v55 = vadd.f32 %v5214_v25, %v5123_v3 }
 0x99a   :  { %v5233_v5 = vadd.f32 %v5223_v52, %v7585_v0  ;;  %v5252_v14 = vsel %vm63_vm0, %v5232_v34, 0.0  ;;  %v5352_v52 = vsub.s32 6, %v7457_v28 }
 0x99b   :  { %v5231_v31 = vadd.f32 %v5215_v55, %v7578_v58  ;;  %v5246_v38 = vsel %vm63_vm0, %v5230_v54, 0.0 }
 0x99c   :  { %5247 = vadd.xlane.f32.xlu1 %v5246_v38  ;;  %v5255_v9 = vsel %vm63_vm0, %v5233_v5, 0.0  ;;  %v5353_v38 = vrot.slane %v7463_v62, %v5352_v52 }
 0x99d   :  { %v5249_v8 = vsel %vm63_vm0, %v5231_v31, 0.0 }
 0x99e   :  { %5250 = vadd.xlane.f32.xlu0 %v5249_v8 }
 0x9a0   :  { %5253 = vadd.xlane.f32.xlu1 %v5252_v14 }
 0x9a2   :  { %5256 = vadd.xlane.f32.xlu0 %v5255_v9 }
 0xa1a   :  { %v5242_v13 = vpop.xlane.xlu1 %5241 }
 0xa1b   :  { %v5260_v1 = vmul.f32 0.03125, %v5242_v13 }
 0xa1c   :  { %v5245_v36 = vpop.xlane.xlu0 %5244 }
 0xa1d   :  { %v7620_v51 = vsub.f32 %v5228_v27, %v5260_v1  ;;  %v5261_v58 = vmul.f32 0.03125, %v5245_v36 }
 0xa1e   :  { %v5236_v10 = vpop.xlane.xlu1 %5235 }
 0xa1f   :  { %v7622_v15 = vsub.f32 %v5229_v43, %v5261_v58  ;;  %v5258_v39 = vmul.f32 0.03125, %v5236_v10  ;;  %v5276_v0 = vmul.f32 %v7620_v51, %v7620_v51 }
 0xa20   :  { %v5239_v20 = vpop.xlane.xlu0 %5238 }
 0xa21   :  { %v7626_v22 = vsub.f32 %v5226_v7, %v5258_v39  ;;  %v5259_v61 = vmul.f32 0.03125, %v5239_v20  ;;  %v5288_v56 = vsel %vm63_vm0, %v5276_v0, 0.0  ;;  %v5277_v33 = vmul.f32 %v7622_v15, %v7622_v15 }
 0xa22   :  { %5289 = vadd.xlane.f32.xlu1 %v5288_v56 }
 0xa23   :  { %v7631_v60 = vsub.f32 %v5227_v16, %v5259_v61  ;;  %v5291_v47 = vsel %vm63_vm0, %v5277_v33, 0.0  ;;  %v5274_v37 = vmul.f32 %v7626_v22, %v7626_v22 }
 0xa24   :  { %5292 = vadd.xlane.f32.xlu0 %v5291_v47 }
 0xa25   :  { %v5282_v46 = vsel %vm63_vm0, %v5274_v37, 0.0  ;;  %v5275_v57 = vmul.f32 %v7631_v60, %v7631_v60 }
 0xa26   :  { %5283 = vadd.xlane.f32.xlu1 %v5282_v46 }
 0xa27   :  { %v5285_v30 = vsel %vm63_vm0, %v5275_v57, 0.0 }
 0xa28   :  { %5286 = vadd.xlane.f32.xlu0 %v5285_v30 }
 0xa29   :  { %v5248_v12 = vpop.xlane.xlu1 %5247 }
 0xa2a   :  { %v5262_v49 = vmul.f32 0.03125, %v5248_v12 }
 0xa2b   :  { %v5251_v23 = vpop.xlane.xlu0 %5250 }
 0xa2c   :  { %v7640_v4 = vsub.f32 %v5230_v54, %v5262_v49  ;;  %v5263_v21 = vmul.f32 0.03125, %v5251_v23  ;;  %v5340_v54 = vsub.s32 5, %v7457_v28 }
 0xa2d   :  { %v5254_v63 = vpop.xlane.xlu1 %5253 }
 0xa2e   :  { %v7642_v48 = vsub.f32 %v5231_v31, %v5263_v21  ;;  %v5264_v19 = vmul.f32 0.03125, %v5254_v63  ;;  %v5278_v45 = vmul.f32 %v7640_v4, %v7640_v4  ;;  %v5341_v55 = vrot.slane %v7463_v62, %v5340_v54 }
 0xa2f   :  { %v5257_v3 = vpop.xlane.xlu0 %5256 }
 0xa30   :  { %v7646_v26 = vsub.f32 %v5232_v34, %v5264_v19  ;;  %v5265_v29 = vmul.f32 0.03125, %v5257_v3  ;;  %v5294_v53 = vsel %vm63_vm0, %v5278_v45, 0.0  ;;  %v5279_v17 = vmul.f32 %v7642_v48, %v7642_v48 }
 0xa31   :  { %5295 = vadd.xlane.f32.xlu1 %v5294_v53 }
 0xa32   :  { %v7651_v59 = vsub.f32 %v5233_v5, %v5265_v29  ;;  %v5297_v27 = vsel %vm63_vm0, %v5279_v17, 0.0  ;;  %v5280_v50 = vmul.f32 %v7646_v26, %v7646_v26 }
 0xa33   :  { %5298 = vadd.xlane.f32.xlu0 %v5297_v27 }
 0xa34   :  { %v5300_v2 = vsel %vm63_vm0, %v5280_v50, 0.0  ;;  %v5281_v11 = vmul.f32 %v7651_v59, %v7651_v59 }
 0xa35   :  { %5301 = vadd.xlane.f32.xlu1 %v5300_v2 }
 0xa36   :  { %v5303_v7 = vsel %vm63_vm0, %v5281_v11, 0.0 }
 0xa37   :  { %5304 = vadd.xlane.f32.xlu0 %v5303_v7 }
 0xaaf   :  { %v5290_v43 = vpop.xlane.xlu1 %5289 }
 0xab0   :  { %v5308_v32 = vmul.f32 0.03125, %v5290_v43 }
 0xab1   :  { %v5293_v16 = vpop.xlane.xlu0 %5292 }
 0xab2   :  { %v5316_v18 = vadd.f32 1e-05, %v5308_v32  ;;  %v5309_v6 = vmul.f32 0.03125, %v5293_v16 }
 0xab3   :  { %v5284_v44 = vpop.xlane.xlu1 %5283 }
 0xab4   :  { %6279 = vrsqrt.f32 %v5316_v18  ;;  %v5317_v42 = vadd.f32 1e-05, %v5309_v6  ;;  %v5306_v40 = vmul.f32 0.03125, %v5284_v44 }
 0xab5   :  { %v5287_v41 = vpop.xlane.xlu0 %5286 }
 0xab6   :  { %6281 = vrsqrt.f32 %v5317_v42  ;;  %v5314_v24 = vadd.f32 1e-05, %v5306_v40  ;;  %v5307_v35 = vmul.f32 0.03125, %v5287_v41 }
 0xab8   :  { %6283 = vrsqrt.f32 %v5314_v24  ;;  %v5315_v25 = vadd.f32 1e-05, %v5307_v35 }
 0xaba   :  { %6285 = vrsqrt.f32 %v5315_v25 }
 0xabe   :  { %v6280_v34 = vpop.eup %6279  ;;  %v5296_v31 = vpop.xlane.xlu1 %5295 }
 0xabf   :  { %v5332_v5 = vmul.f32 %v6280_v34, %v7620_v51  ;;  %v5310_v8 = vmul.f32 0.03125, %v5296_v31 }
 0xac0   :  { %v6282_v14 = vpop.eup %6281  ;;  %v5299_v9 = vpop.xlane.xlu0 %5298 }
 0xac1   :  { %v5344_v13 = vmul.f32 %v5341_v55, %v5332_v5  ;;  %v5333_v1 = vmul.f32 %v6282_v14, %v7622_v15  ;;  %v5318_v36 = vadd.f32 1e-05, %v5310_v8  ;;  %v5311_v58 = vmul.f32 0.03125, %v5299_v9 }
 0xac2   :  { %v6284_v10 = vpop.eup %6283  ;;  %v5302_v39 = vpop.xlane.xlu1 %5301 }
 0xac3   :  { %v5356_v0 = vadd.f32 %v5353_v38, %v5344_v13  ;;  %v5345_v28 = vmul.f32 %v5341_v55, %v5333_v1  ;;  %v5330_v20 = vmul.f32 %v6284_v10, %v7626_v22  ;;  %6287 = vrsqrt.f32 %v5318_v36 }
 0xac4   :  { %v6286_v61 = vpop.eup %6285  ;;  %v5319_v56 = vadd.f32 1e-05, %v5311_v58  ;;  %v5312_v62 = vmul.f32 0.03125, %v5302_v39  ;;  %v5305_v33 = vpop.xlane.xlu0 %5304 }
 0xac5   :  { %5364 = vst.msk [vmem:[%s7711_s7 + $0x10] sm:$0xff] %vm63_vm0, %v5356_v0  ;;  %v5357_v51 = vadd.f32 %v5353_v38, %v5345_v28  ;;  %v5342_v15 = vmul.f32 %v5341_v55, %v5330_v20  ;;  %v5331_v47 = vmul.f32 %v6286_v61, %v7631_v60  ;;  %v5313_v37 = vmul.f32 0.03125, %v5305_v33 }
 0xac6   :  { %6289 = vrsqrt.f32 %v5319_v56  ;;  %v5320_v46 = vadd.f32 1e-05, %v5312_v62 }
 0xac7   :  { %5365 = vst.msk [vmem:[%s7711_s7 + $0x18] sm:$0xff] %vm63_vm0, %v5357_v51  ;;  %v5354_v22 = vadd.f32 %v5353_v38, %v5342_v15  ;;  %v5343_v57 = vmul.f32 %v5341_v55, %v5331_v47  ;;  %v5321_v30 = vadd.f32 1e-05, %v5313_v37 }
 0xac8   :  { %6291 = vrsqrt.f32 %v5320_v46 }
 0xac9   :  { %5362 = vst.msk [vmem:[%s7711_s7] sm:$0xff] %vm63_vm0, %v5354_v22  ;;  %v5355_v12 = vadd.f32 %v5353_v38, %v5343_v57  ;;  %6293 = vrsqrt.f32 %v5321_v30 }
 0xacb   :  { %5363 = vst.msk [vmem:[%s7711_s7 + $0x8] sm:$0xff] %vm63_vm0, %v5355_v12 }
 0xacd   :  { %v6288_v60 = vpop.eup %6287 }
 0xace   :  { %v5334_v49 = vmul.f32 %v6288_v60, %v7640_v4 }
 0xad0   :  { %v6290_v23 = vpop.eup %6289  ;;  %v5346_v21 = vmul.f32 %v5341_v55, %v5334_v49 }
 0xad1   :  { %v5335_v63 = vmul.f32 %v6290_v23, %v7642_v48 }
 0xad2   :  { %v6292_v19 = vpop.eup %6291  ;;  %v5358_v45 = vadd.f32 %v5353_v38, %v5346_v21 }
 0xad3   :  { %v6294_v3 = vpop.eup %6293  ;;  %v5347_v29 = vmul.f32 %v5341_v55, %v5335_v63  ;;  %v5336_v53 = vmul.f32 %v6292_v19, %v7646_v26 }
 0xad4   :  { %5366 = vst.msk [vmem:[%s7711_s7 + $0x20] sm:$0xff] %vm63_vm0, %v5358_v45  ;;  %v5337_v17 = vmul.f32 %v6294_v3, %v7651_v59 }
 0xad5   :  { %v5359_v27 = vadd.f32 %v5353_v38, %v5347_v29  ;;  %v5348_v50 = vmul.f32 %v5341_v55, %v5336_v53 }
 0xad6   :  { %v5349_v4 = vmul.f32 %v5341_v55, %v5337_v17 }
 0xad7   :  { %5367 = vst.msk [vmem:[%s7711_s7 + $0x28] sm:$0xff] %vm63_vm0, %v5359_v27  ;;  %v5360_v48 = vadd.f32 %v5353_v38, %v5348_v50 }
 0xad8   :  { %v5361_v2 = vadd.f32 %v5353_v38, %v5349_v4 }
 0xad9   :  { %5368 = vst.msk [vmem:[%s7711_s7 + $0x30] sm:$0xff] %vm63_vm0, %v5360_v48 }
 0xada   :  { %5369 = vst.msk [vmem:[%s7711_s7 + $0x38] sm:$0xff] %vm63_vm0, %v5361_v2 }

</bundles_post_ra>
